<compile_context>
chip_gen: v7x
topology: tpu7x:2x2x1
jax: 0.10.0
libtpu: 0.0.40
codegen_flags: <defaults>
</compile_context>

<pallas_src>
import functools
import math

import jax
import jax.numpy as jnp
from jax.experimental import pallas as pl
from jax.experimental.pallas import tpu as pltpu


# ---------------------------------------------------------------------------
# One KAN layer on the lane-packed slab (inside the fused kernel)
# ---------------------------------------------------------------------------
def _kan_layer(x_wide, kn_ref, w_base, w_spline, *, order, inv_h, in_f):
    """x_wide: (TB, W0p) lane-packed activation, x_wide[:, j*IN+i] == x[:, i].

    kn_ref : (order+2, W0p) knot tables, row r holds grid[i, j+r] at lane j*IN+i
    w_base : (IN, OUT_wide)   base-path weights (columns pre-tiled for next layer)
    w_spline: (W0p, OUT_wide) spline weights, rows for invalid lane blocks zeroed
    """
    w0p = x_wide.shape[-1]

    # ---- lane-packed Cox-de Boor recursion (all bases of all features at once)
    x_minus_lo = x_wide - kn_ref[0:1, :]                       # x - t_j (reused)
    bases = jnp.logical_and(x_minus_lo >= 0.0,
                            x_wide < kn_ref[1:2, :]).astype(jnp.float32)
    for k in range(1, order + 1):
        inv_kh = inv_h / float(k)            # uniform grid: both denominators == k*h
        left = x_minus_lo * inv_kh
        right = (kn_ref[k + 1:k + 2, :] - x_wide) * inv_kh
        # neighbour basis B_{j+1}: rotate the slab left by one feature block (XLU).
        nbr = pltpu.roll(bases, shift=w0p - in_f, axis=1)
        bases = left * bases + right * nbr
    # bases[:, j*IN+i] == B_j(x_i) for the valid j; garbage blocks hit zero weights.

    # ---- base path: SiLU via EUP exp + approximate EUP reciprocal
    x = x_wide[:, :in_f]
    silu_x = x * pl.reciprocal(1.0 + jnp.exp(-x), approx=True)

    # ---- two MXU dots, no lane concatenation
    y = jnp.dot(silu_x, w_base, preferred_element_type=jnp.float32)
    y = y + jnp.dot(bases, w_spline, preferred_element_type=jnp.float32)
    return y


# ---------------------------------------------------------------------------
# Fused multilayer kernel
# ---------------------------------------------------------------------------
def _multilayer_kan_kernel(*refs, layer_meta):
    # refs = (x_wide_ref, [knots, w_base, w_spline] per layer ..., out_ref)
    x_ref = refs[0]
    out_ref = refs[-1]
    prefs = refs[1:-1]

    x = x_ref[...].astype(jnp.float32)
    for li, (order, inv_h, in_f) in enumerate(layer_meta):
        kn_ref = prefs[3 * li]
        w_base = prefs[3 * li + 1][...]
        w_spline = prefs[3 * li + 2][...]
        x = _kan_layer(x, kn_ref, w_base, w_spline,
                       order=order, inv_h=inv_h, in_f=in_f)
    out_ref[...] = x.astype(out_ref.dtype)


# ---------------------------------------------------------------------------
# One-time packing: natural params -> kernel-ready lane-packed params
# ---------------------------------------------------------------------------
def pack_kan_network(layer_params):
    dims = []
    for p in layer_params:
        grid = p["grid"]
        in_f, m = grid.shape
        order = int(p["spline_order"])
        n0 = m - 1                                    # number of degree-0 bases
        w0 = n0 * in_f
        align = math.lcm(128, in_f)                   # lane-dense, divisible by IN
        w0p = ((w0 + align - 1) // align) * align
        dims.append(dict(in_f=in_f, m=m, order=order, n0=n0, w0p=w0p,
                         out_f=p["base_w"].shape[1]))

    packed = []
    for li, (p, d) in enumerate(zip(layer_params, dims)):
        grid = p["grid"].astype(jnp.float32)
        base_w = p["base_w"].astype(jnp.float32)
        spline_w = p["spline_w"].astype(jnp.float32)
        in_f, m, order, n0, w0p, out_f = (d["in_f"], d["m"], d["order"],
                                          d["n0"], d["w0p"], d["out_f"])
        c = n0 - order                                 # = grid_size + order

        # Guard: packed kernel folds 1/(k*h) in as a constant -> uniform grids only.
        h = float(grid[0, 1] - grid[0, 0])
        if not bool(jnp.allclose(jnp.diff(grid, axis=1), h, rtol=1e-4, atol=1e-5)):
            raise ValueError("pack_kan_network: kernel assumes a uniform knot grid")

        n_rep = w0p // in_f
        # Knot tables: row r, lane j*IN+i -> grid[i, min(j+r, M-1)] (finite padding).
        rows = []
        for r in range(order + 2):
            cols = jnp.minimum(jnp.arange(n_rep) + r, m - 1)
            rows.append(jnp.transpose(grid[:, cols]).reshape(-1))
        knots = jnp.stack(rows, axis=0)               # (order+2, W0p)

        # Spline weights -> rows at lane index j*IN+i; invalid/padded rows zeroed.
        sw = jnp.transpose(spline_w, (1, 0, 2)).reshape(c * in_f, out_f)
        w_sp = jnp.zeros((w0p, out_f), jnp.float32).at[:c * in_f, :].set(sw)
        w_b = base_w

        # Non-final layers: tile output columns so the layer directly emits the
        # next layer's lane-packed x_wide (replication folded into the matmul).
        if li + 1 < len(layer_params):
            nxt = dims[li + 1]
            assert nxt["in_f"] == out_f
            mult = nxt["w0p"] // nxt["in_f"]
            w_b = jnp.tile(w_b, (1, mult))
            w_sp = jnp.tile(w_sp, (1, mult))

        packed.append(dict(knots=knots, w_base=w_b, w_spline=w_sp,
                           order=order, inv_h=1.0 / h, in_f=in_f, w0p=w0p))

    meta = dict(n_rep0=dims[0]["w0p"] // dims[0]["in_f"],
                in0=dims[0]["in_f"],
                out_features=dims[-1]["out_f"])
    return packed, meta


# ---------------------------------------------------------------------------
# Wrapper
# ---------------------------------------------------------------------------
def _pick_batch_tile(batch, batch_tile):
    if batch < 16:
        return batch                       # too small to split; single block
    tb = min(batch_tile, batch)
    if tb >= batch:
        # guarantee >= 2 grid blocks so the "parallel" axis can shard across
        # both TensorCores on v7x (and megacore variants on v5e/v6e)
        tb = ((batch + 1) // 2 + 7) // 8 * 8
    tb = max(8, (tb // 8) * 8)
    return min(tb, batch)


def multilayer_kan_forward(x, packed, meta, *, batch_tile=1024):
    batch = x.shape[0]
    out_f = meta["out_features"]
    tb = _pick_batch_tile(batch, batch_tile)
    grid = (pl.cdiv(batch, tb),)

    # Widen the first layer's input once (plain XLA, outside the kernel).
    x_wide = jnp.tile(x.astype(jnp.float32), (1, meta["n_rep0"]))
    w0p0 = x_wide.shape[1]

    inputs = [x_wide]
    in_specs = [pl.BlockSpec((tb, w0p0), lambda i: (i, 0))]
    layer_meta = []
    max_w = out_f
    params_bytes = 0
    for p in packed:
        inputs.extend([p["knots"], p["w_base"], p["w_spline"]])
        in_specs.extend([
            pl.BlockSpec(p["knots"].shape, lambda i: (0, 0)),
            pl.BlockSpec(p["w_base"].shape, lambda i: (0, 0)),
            pl.BlockSpec(p["w_spline"].shape, lambda i: (0, 0)),
        ])
        layer_meta.append((p["order"], float(p["inv_h"]), p["in_f"]))
        max_w = max(max_w, p["w0p"], p["w_spline"].shape[1])
        params_bytes += 4 * (p["knots"].size + p["w_base"].size + p["w_spline"].size)

    # VMEM budget: ~8 live (tb, W0p) f32 slabs during the recursion + resident
    # params + double-buffered I/O blocks, 2x headroom, clamped to chip limits.
    live = 8 * tb * max_w * 4
    io = 4 * tb * (w0p0 + out_f) * 4
    vmem_limit = int(min(128 << 20, max(32 << 20, 2 * (live + io + params_bytes))))

    kernel = functools.partial(_multilayer_kan_kernel, layer_meta=tuple(layer_meta))
    return pl.pallas_call(
        kernel,
        out_shape=jax.ShapeDtypeStruct((batch, out_f), jnp.float32),
        grid=grid,
        in_specs=in_specs,
        out_specs=pl.BlockSpec((tb, out_f), lambda i: (i, 0)),
        compiler_params=pltpu.CompilerParams(
            dimension_semantics=("parallel",),
            vmem_limit_bytes=vmem_limit),
    )(*inputs)


# ---------------------------------------------------------------------------
# Deterministic parameter init (natural, module-like layout)
# ---------------------------------------------------------------------------
def init_kan_layer(key, in_features, out_features, grid_size=5, spline_order=3,
                   scale_base=1.0, scale_spline=1.0, grid_range=(-1.0, 1.0)):
    k1, k2, k3 = jax.random.split(key, 3)
    h = (grid_range[1] - grid_range[0]) / grid_size
    grid_1d = (jnp.arange(-spline_order, grid_size + spline_order + 1,
                          dtype=jnp.float32) * h + grid_range[0])
    grid = jnp.tile(grid_1d[None, :], (in_features, 1))

    bound = scale_base / (in_features ** 0.5)
    base_w = jax.random.uniform(k1, (in_features, out_features), jnp.float32,
                                -bound, bound)

    n_coeff = grid_size + spline_order
    spline_w = 0.1 * jax.random.normal(k2, (in_features, n_coeff, out_features),
                                       jnp.float32)
    spline_scaler = scale_spline / (in_features ** 0.5) * (
        1.0 + 0.1 * jax.random.normal(k3, (in_features, 1, out_features),
                                      jnp.float32))
    spline_w = spline_w * spline_scaler       # standalone scaler folded in
    return dict(grid=grid, base_w=base_w, spline_w=spline_w,
                spline_order=spline_order)


# ---------------------------------------------------------------------------
# Plain-JAX reference (correctness check only)
# ---------------------------------------------------------------------------
def kan_layer_ref(x, params):
    grid, base_w, spline_w = params["grid"], params["base_w"], params["spline_w"]
    spline_order = params["spline_order"]
    out = (x * jax.nn.sigmoid(x)) @ base_w
    xg = x[:, :, None]
    g = grid[None, :, :]
    bases = ((xg >= g[:, :, :-1]) & (xg < g[:, :, 1:])).astype(jnp.float32)
    for k in range(1, spline_order + 1):
        bases = ((xg - g[:, :, : -(k + 1)]) /
                 (g[:, :, k:-1] - g[:, :, : -(k + 1)]) * bases[:, :, :-1]
                 + (g[:, :, k + 1:] - xg) /
                 (g[:, :, k + 1:] - g[:, :, 1:-k]) * bases[:, :, 1:])
    return out + jnp.einsum('bic,ico->bo', bases, spline_w)


def multilayer_kan_ref(x, layer_params):
    for p in layer_params:
        x = kan_layer_ref(x, p)
    return x


# ---------------------------------------------------------------------------
if __name__ == "__main__":
    key = jax.random.PRNGKey(0)
    kx, k0, k1, k2 = jax.random.split(key, 4)

    layer_configs = [
        dict(in_features=16, out_features=32, grid_size=5, spline_order=3),
        dict(in_features=32, out_features=16, grid_size=5, spline_order=3),
        dict(in_features=16, out_features=8, grid_size=4, spline_order=2),
    ]
    layer_params = [init_kan_layer(lk, **cfg)
                    for lk, cfg in zip([k0, k1, k2], layer_configs)]
    packed, meta = pack_kan_network(layer_params)     # one-time glue

    # Small batch, but >= 2 grid blocks so the parallel axis can use both TCs on v7x.
    batch = 64
    x = jax.random.normal(kx, (batch, layer_configs[0]["in_features"]),
                          dtype=jnp.float32)

    out = jax.block_until_ready(multilayer_kan_forward(x, packed, meta))
    ref = multilayer_kan_ref(x, layer_params)

    assert out.shape == (batch, layer_configs[-1]["out_features"])
    max_err = float(jnp.max(jnp.abs(out - ref)))
    # Tolerance covers the EUP approximate reciprocal used in the SiLU base path.
    assert jnp.allclose(out, ref, rtol=2e-2, atol=5e-3), f"max abs err {max_err}"

    # TODO(synk): regularization_loss() is a training-time statistic (no forward
    # output); not implemented as a kernel.
    print("KERNEL_OK")
</pallas_src>

<mosaic_0001>
module attributes {stable_mosaic.version = 11 : i64} {
  func.func @_multilayer_kan_kernel(%arg0: i32, %arg1: memref<32x256xf32, #tpu.memory_space<vmem>>, %arg2: memref<5x256xf32, #tpu.memory_space<vmem>>, %arg3: memref<16x384xf32, #tpu.memory_space<vmem>>, %arg4: memref<256x384xf32, #tpu.memory_space<vmem>>, %arg5: memref<5x384xf32, #tpu.memory_space<vmem>>, %arg6: memref<32x128xf32, #tpu.memory_space<vmem>>, %arg7: memref<384x128xf32, #tpu.memory_space<vmem>>, %arg8: memref<4x128xf32, #tpu.memory_space<vmem>>, %arg9: memref<16x8xf32, #tpu.memory_space<vmem>>, %arg10: memref<128x8xf32, #tpu.memory_space<vmem>>, %arg11: memref<32x8xf32, #tpu.memory_space<vmem>>) attributes {dimension_semantics = [#tpu.dimension_semantics<parallel>], iteration_bounds = array<i64: 2>, scalar_prefetch = 0 : i64, scratch_operands = 0 : i64, tpu.core_type = #tpu.core_type<tc>, window_params = [{transform_indices = @transform_0, window_bounds = array<i64: 32, 256>}, {pipeline_mode = #tpu.pipeline_mode<synchronous>, transform_indices = @transform_1, window_bounds = array<i64: 5, 256>}, {pipeline_mode = #tpu.pipeline_mode<synchronous>, transform_indices = @transform_2, window_bounds = array<i64: 16, 384>}, {pipeline_mode = #tpu.pipeline_mode<synchronous>, transform_indices = @transform_3, window_bounds = array<i64: 256, 384>}, {pipeline_mode = #tpu.pipeline_mode<synchronous>, transform_indices = @transform_4, window_bounds = array<i64: 5, 384>}, {pipeline_mode = #tpu.pipeline_mode<synchronous>, transform_indices = @transform_5, window_bounds = array<i64: 32, 128>}, {pipeline_mode = #tpu.pipeline_mode<synchronous>, transform_indices = @transform_6, window_bounds = array<i64: 384, 128>}, {pipeline_mode = #tpu.pipeline_mode<synchronous>, transform_indices = @transform_7, window_bounds = array<i64: 4, 128>}, {pipeline_mode = #tpu.pipeline_mode<synchronous>, transform_indices = @transform_8, window_bounds = array<i64: 16, 8>}, {pipeline_mode = #tpu.pipeline_mode<synchronous>, transform_indices = @transform_9, window_bounds = array<i64: 128, 8>}, {transform_indices = @transform_10, window_bounds = array<i64: 32, 8>}]} {
    %c0 = arith.constant 0 : index
    %c0_0 = arith.constant 0 : index
    %0 = vector.load %arg1[%c0, %c0_0] : memref<32x256xf32, #tpu.memory_space<vmem>>, vector<32x256xf32>
    %c0_1 = arith.constant 0 : index
    %c0_2 = arith.constant 0 : index
    %1 = vector.load %arg3[%c0_1, %c0_2] : memref<16x384xf32, #tpu.memory_space<vmem>>, vector<16x384xf32>
    %c0_3 = arith.constant 0 : index
    %c0_4 = arith.constant 0 : index
    %2 = vector.load %arg4[%c0_3, %c0_4] : memref<256x384xf32, #tpu.memory_space<vmem>>, vector<256x384xf32>
    %c0_5 = arith.constant 0 : index
    %c0_6 = arith.constant 0 : index
    %3 = vector.load %arg2[%c0_5, %c0_6] : memref<5x256xf32, #tpu.memory_space<vmem>>, vector<1x256xf32>
    %4 = vector.broadcast %3 : vector<1x256xf32> to vector<32x256xf32>
    %5 = arith.subf %0, %4 : vector<32x256xf32>
    %cst = arith.constant 0.000000e+00 : f32
    %6 = vector.broadcast %cst : f32 to vector<32x256xf32>
    %7 = arith.cmpf oge, %5, %6 : vector<32x256xf32>
    %c1 = arith.constant 1 : index
    %c0_7 = arith.constant 0 : index
    %8 = vector.load %arg2[%c1, %c0_7] : memref<5x256xf32, #tpu.memory_space<vmem>>, vector<1x256xf32>
    %9 = vector.broadcast %8 : vector<1x256xf32> to vector<32x256xf32>
    %10 = arith.cmpf olt, %0, %9 : vector<32x256xf32>
    %11 = arith.andi %7, %10 : vector<32x256xi1>
    %12 = arith.extui %11 : vector<32x256xi1> to vector<32x256xi32>
    %13 = arith.sitofp %12 : vector<32x256xi32> to vector<32x256xf32>
    %cst_8 = arith.constant 2.49999952 : f32
    %14 = vector.broadcast %cst_8 : f32 to vector<32x256xf32>
    %15 = arith.mulf %5, %14 : vector<32x256xf32>
    %c2 = arith.constant 2 : index
    %c0_9 = arith.constant 0 : index
    %16 = vector.load %arg2[%c2, %c0_9] : memref<5x256xf32, #tpu.memory_space<vmem>>, vector<1x256xf32>
    %17 = vector.broadcast %16 : vector<1x256xf32> to vector<32x256xf32>
    %18 = arith.subf %17, %0 : vector<32x256xf32>
    %cst_10 = arith.constant 2.49999952 : f32
    %19 = vector.broadcast %cst_10 : f32 to vector<32x256xf32>
    %20 = arith.mulf %18, %19 : vector<32x256xf32>
    %c240_i32 = arith.constant 240 : i32
    %21 = tpu.dynamic_rotate %13 by %c240_i32 dim 1 : vector<32x256xf32>, i32 -> vector<32x256xf32>
    %22 = arith.mulf %15, %13 : vector<32x256xf32>
    %23 = arith.mulf %20, %21 : vector<32x256xf32>
    %24 = arith.addf %22, %23 : vector<32x256xf32>
    %cst_11 = arith.constant 1.24999976 : f32
    %25 = vector.broadcast %cst_11 : f32 to vector<32x256xf32>
    %26 = arith.mulf %5, %25 : vector<32x256xf32>
    %c3 = arith.constant 3 : index
    %c0_12 = arith.constant 0 : index
    %27 = vector.load %arg2[%c3, %c0_12] : memref<5x256xf32, #tpu.memory_space<vmem>>, vector<1x256xf32>
    %28 = vector.broadcast %27 : vector<1x256xf32> to vector<32x256xf32>
    %29 = arith.subf %28, %0 : vector<32x256xf32>
    %cst_13 = arith.constant 1.24999976 : f32
    %30 = vector.broadcast %cst_13 : f32 to vector<32x256xf32>
    %31 = arith.mulf %29, %30 : vector<32x256xf32>
    %c240_i32_14 = arith.constant 240 : i32
    %32 = tpu.dynamic_rotate %24 by %c240_i32_14 dim 1 : vector<32x256xf32>, i32 -> vector<32x256xf32>
    %33 = arith.mulf %26, %24 : vector<32x256xf32>
    %34 = arith.mulf %31, %32 : vector<32x256xf32>
    %35 = arith.addf %33, %34 : vector<32x256xf32>
    %cst_15 = arith.constant 0.833333134 : f32
    %36 = vector.broadcast %cst_15 : f32 to vector<32x256xf32>
    %37 = arith.mulf %5, %36 : vector<32x256xf32>
    %c4 = arith.constant 4 : index
    %c0_16 = arith.constant 0 : index
    %38 = vector.load %arg2[%c4, %c0_16] : memref<5x256xf32, #tpu.memory_space<vmem>>, vector<1x256xf32>
    %39 = vector.broadcast %38 : vector<1x256xf32> to vector<32x256xf32>
    %40 = arith.subf %39, %0 : vector<32x256xf32>
    %cst_17 = arith.constant 0.833333134 : f32
    %41 = vector.broadcast %cst_17 : f32 to vector<32x256xf32>
    %42 = arith.mulf %40, %41 : vector<32x256xf32>
    %c240_i32_18 = arith.constant 240 : i32
    %43 = tpu.dynamic_rotate %35 by %c240_i32_18 dim 1 : vector<32x256xf32>, i32 -> vector<32x256xf32>
    %44 = arith.mulf %37, %35 : vector<32x256xf32>
    %45 = arith.mulf %42, %43 : vector<32x256xf32>
    %46 = arith.addf %44, %45 : vector<32x256xf32>
    %47 = vector.extract_strided_slice %0 {offsets = [0, 0], sizes = [32, 16], strides = [1, 1]} : vector<32x256xf32> to vector<32x16xf32>
    %cst_19 = arith.constant 0.000000e+00 : f32
    %48 = vector.broadcast %cst_19 : f32 to vector<32x16xf32>
    %49 = arith.subf %48, %47 : vector<32x16xf32>
    %50 = math.exp %49 : vector<32x16xf32>
    %cst_20 = arith.constant 1.000000e+00 : f32
    %51 = vector.broadcast %cst_20 : f32 to vector<32x16xf32>
    %52 = arith.addf %51, %50 : vector<32x16xf32>
    %53 = tpu.reciprocal %52 {approx = true} : vector<32x16xf32> -> vector<32x16xf32>
    %54 = arith.mulf %47, %53 : vector<32x16xf32>
    %cst_21 = arith.constant dense<0.000000e+00> : vector<32x384xf32>
    %55 = tpu.matmul %54, %1, %cst_21 {dimension_numbers = #tpu.dot_dimension_numbers<[1], [0], [0], [1], [0, 0, 1, 1], [], []>} : vector<32x16xf32>, vector<16x384xf32>, vector<32x384xf32> -> vector<32x384xf32>
    %cst_22 = arith.constant dense<0.000000e+00> : vector<32x384xf32>
    %56 = tpu.matmul %46, %2, %cst_22 {dimension_numbers = #tpu.dot_dimension_numbers<[1], [0], [0], [1], [0, 0, 1, 1], [], []>} : vector<32x256xf32>, vector<256x384xf32>, vector<32x384xf32> -> vector<32x384xf32>
    %57 = arith.addf %55, %56 : vector<32x384xf32>
    %c0_23 = arith.constant 0 : index
    %c0_24 = arith.constant 0 : index
    %58 = vector.load %arg6[%c0_23, %c0_24] : memref<32x128xf32, #tpu.memory_space<vmem>>, vector<32x128xf32>
    %c0_25 = arith.constant 0 : index
    %c0_26 = arith.constant 0 : index
    %59 = vector.load %arg7[%c0_25, %c0_26] : memref<384x128xf32, #tpu.memory_space<vmem>>, vector<384x128xf32>
    %c0_27 = arith.constant 0 : index
    %c0_28 = arith.constant 0 : index
    %60 = vector.load %arg5[%c0_27, %c0_28] : memref<5x384xf32, #tpu.memory_space<vmem>>, vector<1x384xf32>
    %61 = vector.broadcast %60 : vector<1x384xf32> to vector<32x384xf32>
    %62 = arith.subf %57, %61 : vector<32x384xf32>
    %cst_29 = arith.constant 0.000000e+00 : f32
    %63 = vector.broadcast %cst_29 : f32 to vector<32x384xf32>
    %64 = arith.cmpf oge, %62, %63 : vector<32x384xf32>
    %c1_30 = arith.constant 1 : index
    %c0_31 = arith.constant 0 : index
    %65 = vector.load %arg5[%c1_30, %c0_31] : memref<5x384xf32, #tpu.memory_space<vmem>>, vector<1x384xf32>
    %66 = vector.broadcast %65 : vector<1x384xf32> to vector<32x384xf32>
    %67 = arith.cmpf olt, %57, %66 : vector<32x384xf32>
    %68 = arith.andi %64, %67 : vector<32x384xi1>
    %69 = arith.extui %68 : vector<32x384xi1> to vector<32x384xi32>
    %70 = arith.sitofp %69 : vector<32x384xi32> to vector<32x384xf32>
    %cst_32 = arith.constant 2.49999952 : f32
    %71 = vector.broadcast %cst_32 : f32 to vector<32x384xf32>
    %72 = arith.mulf %62, %71 : vector<32x384xf32>
    %c2_33 = arith.constant 2 : index
    %c0_34 = arith.constant 0 : index
    %73 = vector.load %arg5[%c2_33, %c0_34] : memref<5x384xf32, #tpu.memory_space<vmem>>, vector<1x384xf32>
    %74 = vector.broadcast %73 : vector<1x384xf32> to vector<32x384xf32>
    %75 = arith.subf %74, %57 : vector<32x384xf32>
    %cst_35 = arith.constant 2.49999952 : f32
    %76 = vector.broadcast %cst_35 : f32 to vector<32x384xf32>
    %77 = arith.mulf %75, %76 : vector<32x384xf32>
    %c352_i32 = arith.constant 352 : i32
    %78 = tpu.dynamic_rotate %70 by %c352_i32 dim 1 : vector<32x384xf32>, i32 -> vector<32x384xf32>
    %79 = arith.mulf %72, %70 : vector<32x384xf32>
    %80 = arith.mulf %77, %78 : vector<32x384xf32>
    %81 = arith.addf %79, %80 : vector<32x384xf32>
    %cst_36 = arith.constant 1.24999976 : f32
    %82 = vector.broadcast %cst_36 : f32 to vector<32x384xf32>
    %83 = arith.mulf %62, %82 : vector<32x384xf32>
    %c3_37 = arith.constant 3 : index
    %c0_38 = arith.constant 0 : index
    %84 = vector.load %arg5[%c3_37, %c0_38] : memref<5x384xf32, #tpu.memory_space<vmem>>, vector<1x384xf32>
    %85 = vector.broadcast %84 : vector<1x384xf32> to vector<32x384xf32>
    %86 = arith.subf %85, %57 : vector<32x384xf32>
    %cst_39 = arith.constant 1.24999976 : f32
    %87 = vector.broadcast %cst_39 : f32 to vector<32x384xf32>
    %88 = arith.mulf %86, %87 : vector<32x384xf32>
    %c352_i32_40 = arith.constant 352 : i32
    %89 = tpu.dynamic_rotate %81 by %c352_i32_40 dim 1 : vector<32x384xf32>, i32 -> vector<32x384xf32>
    %90 = arith.mulf %83, %81 : vector<32x384xf32>
    %91 = arith.mulf %88, %89 : vector<32x384xf32>
    %92 = arith.addf %90, %91 : vector<32x384xf32>
    %cst_41 = arith.constant 0.833333134 : f32
    %93 = vector.broadcast %cst_41 : f32 to vector<32x384xf32>
    %94 = arith.mulf %62, %93 : vector<32x384xf32>
    %c4_42 = arith.constant 4 : index
    %c0_43 = arith.constant 0 : index
    %95 = vector.load %arg5[%c4_42, %c0_43] : memref<5x384xf32, #tpu.memory_space<vmem>>, vector<1x384xf32>
    %96 = vector.broadcast %95 : vector<1x384xf32> to vector<32x384xf32>
    %97 = arith.subf %96, %57 : vector<32x384xf32>
    %cst_44 = arith.constant 0.833333134 : f32
    %98 = vector.broadcast %cst_44 : f32 to vector<32x384xf32>
    %99 = arith.mulf %97, %98 : vector<32x384xf32>
    %c352_i32_45 = arith.constant 352 : i32
    %100 = tpu.dynamic_rotate %92 by %c352_i32_45 dim 1 : vector<32x384xf32>, i32 -> vector<32x384xf32>
    %101 = arith.mulf %94, %92 : vector<32x384xf32>
    %102 = arith.mulf %99, %100 : vector<32x384xf32>
    %103 = arith.addf %101, %102 : vector<32x384xf32>
    %104 = vector.extract_strided_slice %57 {offsets = [0, 0], sizes = [32, 32], strides = [1, 1]} : vector<32x384xf32> to vector<32x32xf32>
    %cst_46 = arith.constant 0.000000e+00 : f32
    %105 = vector.broadcast %cst_46 : f32 to vector<32x32xf32>
    %106 = arith.subf %105, %104 : vector<32x32xf32>
    %107 = math.exp %106 : vector<32x32xf32>
    %cst_47 = arith.constant 1.000000e+00 : f32
    %108 = vector.broadcast %cst_47 : f32 to vector<32x32xf32>
    %109 = arith.addf %108, %107 : vector<32x32xf32>
    %110 = tpu.reciprocal %109 {approx = true} : vector<32x32xf32> -> vector<32x32xf32>
    %111 = arith.mulf %104, %110 : vector<32x32xf32>
    %cst_48 = arith.constant dense<0.000000e+00> : vector<32x128xf32>
    %112 = tpu.matmul %111, %58, %cst_48 {dimension_numbers = #tpu.dot_dimension_numbers<[1], [0], [0], [1], [0, 0, 1, 1], [], []>} : vector<32x32xf32>, vector<32x128xf32>, vector<32x128xf32> -> vector<32x128xf32>
    %cst_49 = arith.constant dense<0.000000e+00> : vector<32x128xf32>
    %113 = tpu.matmul %103, %59, %cst_49 {dimension_numbers = #tpu.dot_dimension_numbers<[1], [0], [0], [1], [0, 0, 1, 1], [], []>} : vector<32x384xf32>, vector<384x128xf32>, vector<32x128xf32> -> vector<32x128xf32>
    %114 = arith.addf %112, %113 : vector<32x128xf32>
    %c0_50 = arith.constant 0 : index
    %c0_51 = arith.constant 0 : index
    %115 = vector.load %arg9[%c0_50, %c0_51] : memref<16x8xf32, #tpu.memory_space<vmem>>, vector<16x8xf32>
    %c0_52 = arith.constant 0 : index
    %c0_53 = arith.constant 0 : index
    %116 = vector.load %arg10[%c0_52, %c0_53] : memref<128x8xf32, #tpu.memory_space<vmem>>, vector<128x8xf32>
    %c0_54 = arith.constant 0 : index
    %c0_55 = arith.constant 0 : index
    %117 = vector.load %arg8[%c0_54, %c0_55] : memref<4x128xf32, #tpu.memory_space<vmem>>, vector<1x128xf32>
    %118 = vector.broadcast %117 : vector<1x128xf32> to vector<32x128xf32>
    %119 = arith.subf %114, %118 : vector<32x128xf32>
    %cst_56 = arith.constant 0.000000e+00 : f32
    %120 = vector.broadcast %cst_56 : f32 to vector<32x128xf32>
    %121 = arith.cmpf oge, %119, %120 : vector<32x128xf32>
    %c1_57 = arith.constant 1 : index
    %c0_58 = arith.constant 0 : index
    %122 = vector.load %arg8[%c1_57, %c0_58] : memref<4x128xf32, #tpu.memory_space<vmem>>, vector<1x128xf32>
    %123 = vector.broadcast %122 : vector<1x128xf32> to vector<32x128xf32>
    %124 = arith.cmpf olt, %114, %123 : vector<32x128xf32>
    %125 = arith.andi %121, %124 : vector<32x128xi1>
    %126 = arith.extui %125 : vector<32x128xi1> to vector<32x128xi32>
    %127 = arith.sitofp %126 : vector<32x128xi32> to vector<32x128xf32>
    %cst_59 = arith.constant 2.000000e+00 : f32
    %128 = vector.broadcast %cst_59 : f32 to vector<32x128xf32>
    %129 = arith.mulf %119, %128 : vector<32x128xf32>
    %c2_60 = arith.constant 2 : index
    %c0_61 = arith.constant 0 : index
    %130 = vector.load %arg8[%c2_60, %c0_61] : memref<4x128xf32, #tpu.memory_space<vmem>>, vector<1x128xf32>
    %131 = vector.broadcast %130 : vector<1x128xf32> to vector<32x128xf32>
    %132 = arith.subf %131, %114 : vector<32x128xf32>
    %cst_62 = arith.constant 2.000000e+00 : f32
    %133 = vector.broadcast %cst_62 : f32 to vector<32x128xf32>
    %134 = arith.mulf %132, %133 : vector<32x128xf32>
    %c112_i32 = arith.constant 112 : i32
    %135 = tpu.dynamic_rotate %127 by %c112_i32 dim 1 : vector<32x128xf32>, i32 -> vector<32x128xf32>
    %136 = arith.mulf %129, %127 : vector<32x128xf32>
    %137 = arith.mulf %134, %135 : vector<32x128xf32>
    %138 = arith.addf %136, %137 : vector<32x128xf32>
    %cst_63 = arith.constant 1.000000e+00 : f32
    %139 = vector.broadcast %cst_63 : f32 to vector<32x128xf32>
    %140 = arith.mulf %119, %139 : vector<32x128xf32>
    %c3_64 = arith.constant 3 : index
    %c0_65 = arith.constant 0 : index
    %141 = vector.load %arg8[%c3_64, %c0_65] : memref<4x128xf32, #tpu.memory_space<vmem>>, vector<1x128xf32>
    %142 = vector.broadcast %141 : vector<1x128xf32> to vector<32x128xf32>
    %143 = arith.subf %142, %114 : vector<32x128xf32>
    %cst_66 = arith.constant 1.000000e+00 : f32
    %144 = vector.broadcast %cst_66 : f32 to vector<32x128xf32>
    %145 = arith.mulf %143, %144 : vector<32x128xf32>
    %c112_i32_67 = arith.constant 112 : i32
    %146 = tpu.dynamic_rotate %138 by %c112_i32_67 dim 1 : vector<32x128xf32>, i32 -> vector<32x128xf32>
    %147 = arith.mulf %140, %138 : vector<32x128xf32>
    %148 = arith.mulf %145, %146 : vector<32x128xf32>
    %149 = arith.addf %147, %148 : vector<32x128xf32>
    %150 = vector.extract_strided_slice %114 {offsets = [0, 0], sizes = [32, 16], strides = [1, 1]} : vector<32x128xf32> to vector<32x16xf32>
    %cst_68 = arith.constant 0.000000e+00 : f32
    %151 = vector.broadcast %cst_68 : f32 to vector<32x16xf32>
    %152 = arith.subf %151, %150 : vector<32x16xf32>
    %153 = math.exp %152 : vector<32x16xf32>
    %cst_69 = arith.constant 1.000000e+00 : f32
    %154 = vector.broadcast %cst_69 : f32 to vector<32x16xf32>
    %155 = arith.addf %154, %153 : vector<32x16xf32>
    %156 = tpu.reciprocal %155 {approx = true} : vector<32x16xf32> -> vector<32x16xf32>
    %157 = arith.mulf %150, %156 : vector<32x16xf32>
    %cst_70 = arith.constant dense<0.000000e+00> : vector<32x8xf32>
    %158 = tpu.matmul %157, %115, %cst_70 {dimension_numbers = #tpu.dot_dimension_numbers<[1], [0], [0], [1], [0, 0, 1, 1], [], []>} : vector<32x16xf32>, vector<16x8xf32>, vector<32x8xf32> -> vector<32x8xf32>
    %cst_71 = arith.constant dense<0.000000e+00> : vector<32x8xf32>
    %159 = tpu.matmul %149, %116, %cst_71 {dimension_numbers = #tpu.dot_dimension_numbers<[1], [0], [0], [1], [0, 0, 1, 1], [], []>} : vector<32x128xf32>, vector<128x8xf32>, vector<32x8xf32> -> vector<32x8xf32>
    %160 = arith.addf %158, %159 : vector<32x8xf32>
    %c0_72 = arith.constant 0 : index
    %c0_73 = arith.constant 0 : index
    %161 = vector.load %arg11[%c0_72, %c0_73] : memref<32x8xf32, #tpu.memory_space<vmem>>, vector<32x8xf32>
    tpu.vector_store %arg11[%c0_72, %c0_73], %160 {strides = array<i32>} : memref<32x8xf32, #tpu.memory_space<vmem>>, vector<32x8xf32>,
    return
  }
  func.func @transform_0(%arg0: i32) -> (i32, i32) {
    %c0_i32 = arith.constant 0 : i32
    %c0_i32_0 = arith.constant 0 : i32
    return %arg0, %c0_i32 : i32, i32
  }
  func.func @transform_1(%arg0: i32) -> (i32, i32) {
    %c0_i32 = arith.constant 0 : i32
    %c0_i32_0 = arith.constant 0 : i32
    %c0_i32_1 = arith.constant 0 : i32
    return %c0_i32, %c0_i32_0 : i32, i32
  }
  func.func @transform_2(%arg0: i32) -> (i32, i32) {
    %c0_i32 = arith.constant 0 : i32
    %c0_i32_0 = arith.constant 0 : i32
    %c0_i32_1 = arith.constant 0 : i32
    return %c0_i32, %c0_i32_0 : i32, i32
  }
  func.func @transform_3(%arg0: i32) -> (i32, i32) {
    %c0_i32 = arith.constant 0 : i32
    %c0_i32_0 = arith.constant 0 : i32
    %c0_i32_1 = arith.constant 0 : i32
    return %c0_i32, %c0_i32_0 : i32, i32
  }
  func.func @transform_4(%arg0: i32) -> (i32, i32) {
    %c0_i32 = arith.constant 0 : i32
    %c0_i32_0 = arith.constant 0 : i32
    %c0_i32_1 = arith.constant 0 : i32
    return %c0_i32, %c0_i32_0 : i32, i32
  }
  func.func @transform_5(%arg0: i32) -> (i32, i32) {
    %c0_i32 = arith.constant 0 : i32
    %c0_i32_0 = arith.constant 0 : i32
    %c0_i32_1 = arith.constant 0 : i32
    return %c0_i32, %c0_i32_0 : i32, i32
  }
  func.func @transform_6(%arg0: i32) -> (i32, i32) {
    %c0_i32 = arith.constant 0 : i32
    %c0_i32_0 = arith.constant 0 : i32
    %c0_i32_1 = arith.constant 0 : i32
    return %c0_i32, %c0_i32_0 : i32, i32
  }
  func.func @transform_7(%arg0: i32) -> (i32, i32) {
    %c0_i32 = arith.constant 0 : i32
    %c0_i32_0 = arith.constant 0 : i32
    %c0_i32_1 = arith.constant 0 : i32
    return %c0_i32, %c0_i32_0 : i32, i32
  }
  func.func @transform_8(%arg0: i32) -> (i32, i32) {
    %c0_i32 = arith.constant 0 : i32
    %c0_i32_0 = arith.constant 0 : i32
    %c0_i32_1 = arith.constant 0 : i32
    return %c0_i32, %c0_i32_0 : i32, i32
  }
  func.func @transform_9(%arg0: i32) -> (i32, i32) {
    %c0_i32 = arith.constant 0 : i32
    %c0_i32_0 = arith.constant 0 : i32
    %c0_i32_1 = arith.constant 0 : i32
    return %c0_i32, %c0_i32_0 : i32, i32
  }
  func.func @transform_10(%arg0: i32) -> (i32, i32) {
    %c0_i32 = arith.constant 0 : i32
    %c0_i32_0 = arith.constant 0 : i32
    return %arg0, %c0_i32 : i32, i32
  }
}

</mosaic_0001>

<bundles_post_ra>
// kernel: tpu_custom_call.1
= control target key start
LH: loop header
LB: loop body
LE: loop exit
PB: predicated region body
PF: predicated region fallthrough
CT: control target
= control target key end

     0   :  { %15 = vsyncpa [#allocation3], 0  ;;  %s4712_s0 = inlined_call_operand.vmem [shape: f32[64,256], index: 0, kind: input, shape index: {}]   ;;  %s4713_s1 = inlined_call_operand.hbm [shape: f32[5,256], index: 1, kind: input, shape index: {}]   ;;  %s4714_s2 = inlined_call_operand.hbm [shape: f32[16,384], index: 2, kind: input, shape index: {}]   ;;  %s4715_s3 = inlined_call_operand.hbm [shape: f32[256,384], index: 3, kind: input, shape index: {}]   ;;  %s4716_s4 = inlined_call_operand.hbm [shape: f32[5,384], index: 4, kind: input, shape index: {}]   ;;  %s4717_s5 = inlined_call_operand.vmem [shape: f32[32,128], index: 5, kind: input, shape index: {}]   ;;  %s4718_s6 = inlined_call_operand.hbm [shape: f32[384,128], index: 6, kind: input, shape index: {}]   ;;  %s4719_s7 = inlined_call_operand.vmem [shape: f32[4,128], index: 7, kind: input, shape index: {}]   ;;  %s4720_s8 = inlined_call_operand.vmem [shape: f32[16,8], index: 8, kind: input, shape index: {}]   ;;  %s4721_s9 = inlined_call_operand.vmem [shape: f32[128,8], index: 9, kind: input, shape index: {}]   ;;  %s4722_s10 = inlined_call_operand.vmem [shape: f32[64,8], index: 10, kind: output, shape index: {}]  }
   0x1   :  { %16 = vsyncpa [#allocation5], 0 }
   0x2   :  { %17 = vsyncpa [#allocation8], 0  ;;  %s3488_s13 = smov 0  }
   0x3 LB: > { %s3421_s14 = smov [#allocation4]   ;;  %s4723_s16 = sadd.s32 4294967295, %s3419_s13   ;;  %s3419_s13 = sphi %s3488_s13, %s23_s13  }
   0x4   : > { %s292_s15 = sshll.u32 %s3421_s14, 4  ;;  %p2528_p0 = scmp.ge.s32.totalorder %s3419_s13, 1  ;;  %s3502_s15 = int_to_ptr.vmem [resolvable:$true] %s292_s15 }
   0x5   : > { %p269_p1 = scmp.lt.s32.totalorder %s3419_s13, 3  ;;  %p3498_p2 = scmp.eq.s32.totalorder %s4723_s16, 0 }
   0x6   : > { %s3422_s19 = smov [#allocation7]   ;;  %s3423_s22 = smov [#allocation2]  }
   0x7   : > { %s4752_s17 = scalar_select %p3498_p2, 1, 0 }
   0x8   : > { %p3504_p3 = pnand %p2528_p0, %p269_p1  ;;  %s319_s20 = sshll.u32 %s3422_s19, 4  ;;  %s3510_s20 = int_to_ptr.vmem [resolvable:$true] %s319_s20 }
   0x9   : > { %s282_s23 = sshll.u32 %s3423_s22, 4  ;;  %s3424_s24 = smov [#allocation6]   ;;  %s3518_s23 = int_to_ptr.vmem [resolvable:$true] %s282_s23 }
   0xa   : > { %s4753_s18 = scalar_select %p3504_p3, 1, 0 }
   0xb   : > { %p3103_p4 = pneg %p3504_p3  ;;  %s3520_s25 = sshll.u32 %s3424_s24, 4  ;;  %s306_s25 = int_to_ptr.vmem [resolvable:$true] %s3520_s25 }
   0xc   : > { %s3261_s28 = scalar_lea.hbm %s4714_s2, 768 }
   0xd   : > { %p3514_p5 = pnand %p3498_p2, %p3103_p4  ;;  %p3262_p6 = scmp.ne.s32.totalorder %s4714_s2, %s3261_s28 }
   0xe   : > { %p3268_p10 = scmp.lt.u32.totalorder %s3261_s28, %s4714_s2 }
   0xf   : > { %p3530_p7 = pneg %p3514_p5 }
  0x11   : > { %p3264_p8 = pnand %p3530_p7, %p3262_p6 }
  0x13   : > { %p3265_p9 = pneg %p3264_p8 }
  0x15   : > { %p3270_p11 = pnand %p3268_p10, %p3265_p9 }
  0x17   : > { %3273 = shalt.err (!%p3270_p11)
}
  0x18   : > { %s3274_s19 = scalar_lea.vmem %s3502_s15, 768  ;;  %p3282_p1 = scmp.lt.s32.totalorder %s3502_s15, %s3502_s15 }
  0x19   : > { %p3275_p12 = scmp.ne.s32.totalorder %s3502_s15, %s3274_s19  ;;  %p3283_p4 = scmp.lt.s32.totalorder %s3274_s19, %s3274_s19 }
  0x1b   : > { %p3277_p13 = pnand %p3275_p12, %p3530_p7  ;;  %p3284_p6 = por %p3283_p4, %p3282_p1 }
  0x1d   : > { %p3278_p0 = pneg %p3277_p13 }
  0x1f   : > { %p3285_p8 = pnand %p3284_p6, %p3278_p0 }
  0x21   : > { %3288 = shalt.err (!%p3285_p8)
}
  0x22   : > { %s3425_s22 = smov 384   ;;  %s3426_s24 = smov 24  }
  0x23   : > { %3109 = dma.hbm_to_vmem [thread:$0]  (!%p3514_p5), %s4714_s2, 768, %s3502_s15, [#allocation5], %s3425_s22, %s3425_s22, %s3426_s24  }
  0x24   : > { %s3289_s30 = scalar_lea.hbm %s4716_s4, 384 }
  0x25   : > { %p3290_p9 = scmp.ne.s32.totalorder %s4716_s4, %s3289_s30  ;;  %p3296_p12 = scmp.lt.u32.totalorder %s3289_s30, %s4716_s4 }
  0x27   : > { %p3292_p10 = pnand %p3290_p9, %p3530_p7 }
  0x29   : > { %p3293_p11 = pneg %p3292_p10 }
  0x2b   : > { %p3298_p13 = pnand %p3296_p12, %p3293_p11 }
  0x2d   : > { %3301 = shalt.err (!%p3298_p13)
}
  0x2e   : > { %s3302_s15 = scalar_lea.vmem %s3510_s20, 384  ;;  %p3310_p6 = scmp.lt.s32.totalorder %s3510_s20, %s3510_s20 }
  0x2f   : > { %p3303_p0 = scmp.ne.s32.totalorder %s3510_s20, %s3302_s15  ;;  %p3311_p8 = scmp.lt.s32.totalorder %s3302_s15, %s3302_s15 }
  0x31   : > { %p3305_p1 = pnand %p3303_p0, %p3530_p7  ;;  %p3312_p9 = por %p3311_p8, %p3310_p6 }
  0x33   : > { %p3306_p4 = pneg %p3305_p1 }
  0x35   : > { %p3313_p10 = pnand %p3312_p9, %p3306_p4 }
  0x37   : > { %3316 = shalt.err (!%p3313_p10)
}
  0x38   : > { %3115 = dma.hbm_to_vmem [thread:$0]  (!%p3514_p5), %s4716_s4, 384, %s3510_s20, [#allocation8]  }
  0x39   : > { %s3317_s29 = scalar_lea.hbm %s4713_s1, 256 }
  0x3a   : > { %p3318_p11 = scmp.ne.s32.totalorder %s4713_s1, %s3317_s29  ;;  %p3324_p0 = scmp.lt.u32.totalorder %s3317_s29, %s4713_s1 }
  0x3c   : > { %p3320_p12 = pnand %p3318_p11, %p3530_p7 }
  0x3e   : > { %p3321_p13 = pneg %p3320_p12 }
  0x40   : > { %p3326_p1 = pnand %p3324_p0, %p3321_p13 }
  0x42   : > { %3329 = shalt.err (!%p3326_p1)
}
  0x43   : > { %s3330_s20 = scalar_lea.vmem %s3518_s23, 256  ;;  %p3338_p9 = scmp.lt.s32.totalorder %s3518_s23, %s3518_s23 }
  0x44   : > { %p3331_p4 = scmp.ne.s32.totalorder %s3518_s23, %s3330_s20  ;;  %p3339_p10 = scmp.lt.s32.totalorder %s3330_s20, %s3330_s20 }
  0x46   : > { %p3333_p6 = pnand %p3331_p4, %p3530_p7  ;;  %p3340_p11 = por %p3339_p10, %p3338_p9 }
  0x48   : > { %p3334_p8 = pneg %p3333_p6 }
  0x4a   : > { %p3341_p12 = pnand %p3340_p11, %p3334_p8 }
  0x4c   : > { %3344 = shalt.err (!%p3341_p12)
}
  0x4d   : > { %3106 = dma.hbm_to_vmem [thread:$0]  (!%p3514_p5), %s4713_s1, 256, %s3518_s23, [#allocation3]  }
  0x4e   : > { %s3345_s28 = scalar_lea.hbm %s4715_s3, 12288 }
  0x4f   : > { %p3346_p13 = scmp.ne.s32.totalorder %s4715_s3, %s3345_s28  ;;  %p3352_p4 = scmp.lt.u32.totalorder %s3345_s28, %s4715_s3 }
  0x51   : > { %p3348_p0 = pnand %p3346_p13, %p3530_p7 }
  0x53   : > { %p3349_p1 = pneg %p3348_p0 }
  0x55   : > { %p3354_p6 = pnand %p3352_p4, %p3349_p1 }
  0x57   : > { %3357 = shalt.err (!%p3354_p6)
}
  0x58   : > { %s3358_s19 = scalar_lea.vmem %s306_s25, 12288  ;;  %p3366_p11 = scmp.lt.s32.totalorder %s306_s25, %s306_s25 }
  0x59   : > { %p3359_p8 = scmp.ne.s32.totalorder %s306_s25, %s3358_s19  ;;  %p3367_p12 = scmp.lt.s32.totalorder %s3358_s19, %s3358_s19 }
  0x5b   : > { %p3361_p9 = pnand %p3359_p8, %p3530_p7  ;;  %p3368_p2 = por %p3367_p12, %p3366_p11 }
  0x5d   : > { %p3362_p10 = pneg %p3361_p9 }
  0x5f   : > { %p3369_p3 = pnand %p3368_p2, %p3362_p10 }
  0x61   : > { %3372 = shalt.err (!%p3369_p3)
}
  0x62   : > { %3112 = dma.hbm_to_vmem [thread:$0]  (!%p3514_p5), %s4715_s3, 12288, %s306_s25, [#allocation5], %s3425_s22, %s3425_s22, %s3426_s24  }
  0x63   : > { %s3427_s15 = smov [#allocation9]   ;;  %s3373_s28 = scalar_lea.hbm %s4718_s6, 6144 }
  0x64   : > { %s332_s16 = sshll.u32 %s3427_s15, 4  ;;  %p3374_p2 = scmp.ne.s32.totalorder %s4718_s6, %s3373_s28  ;;  %s333_s16 = int_to_ptr.vmem [resolvable:$true] %s332_s16 }
  0x65   : > { %p3380_p0 = scmp.lt.u32.totalorder %s3373_s28, %s4718_s6 }
  0x66   : > { %p3376_p3 = pnand %p3374_p2, %p3530_p7 }
  0x68   : > { %p3377_p13 = pneg %p3376_p3 }
  0x6a   : > { %p3382_p1 = pnand %p3380_p0, %p3377_p13 }
  0x6c   : > { %3385 = shalt.err (!%p3382_p1)
}
  0x6d   : > { %s3386_s25 = scalar_lea.vmem %s333_s16, 6144  ;;  %p3394_p9 = scmp.lt.s32.totalorder %s333_s16, %s333_s16 }
  0x6e   : > { %p3387_p4 = scmp.ne.s32.totalorder %s333_s16, %s3386_s25  ;;  %p3395_p10 = scmp.lt.s32.totalorder %s3386_s25, %s3386_s25 }
  0x70   : > { %p3389_p6 = pnand %p3387_p4, %p3530_p7  ;;  %p3396_p11 = por %p3395_p10, %p3394_p9 }
  0x72   : > { %p3390_p8 = pneg %p3389_p6 }
  0x74   : > { %p3397_p12 = pnand %p3396_p11, %p3390_p8 }
  0x76   : > { %3400 = shalt.err (!%p3397_p12)
}
  0x77   : > { %s3428_s22 = smov 128   ;;  %s3429_s24 = smov 8  }
  0x78   : > { %3118 = dma.hbm_to_vmem [thread:$0]  (!%p3514_p5), %s4718_s6, 6144, %s333_s16, [#allocation8], %s3428_s22, %s3428_s22, %s3429_s24  }
  0x79   : > { %p4756_p2 = scmp.ne.s32.totalorder %s4753_s18, 0 }
  0x7b   : > { %367 = sbr.rel (%p4756_p2) target bundleno = 1833 (0x729), region = 60 }
  0x82   : > { %p4757_p3 = scmp.ne.s32.totalorder %s4752_s17, 0 }
  0x84   : > { %3406 = dma.done.wait (%p4757_p3), [#allocation3], 256  }
  0x85   : > { %3408 = vsyncadd (%p4757_p3), [#allocation3], 4294967040 }
  0x86   : > { %3410 = dma.done.wait (%p4757_p3), [#allocation5], 13056  }
  0x87   : > { %3412 = vsyncadd (%p4757_p3), [#allocation5], 4294954240 }
  0x88   : > { %3414 = dma.done.wait (%p4757_p3), [#allocation8], 6528  }
  0x89   : > { %3416 = vsyncadd (%p4757_p3), [#allocation8], 4294960768  ;;  %s4758_s18 = sadd.s32 4294967295, %s3419_s13   ;;  %v547_v0 = vlaneseq  ;;  %v545_v6 = vld [vmem:[#allocation2] ss:$8 sm:$0x3] }
  0x8a   : > { %s2541_s21 = sshll.u32 %s4758_s18, 2  ;;  %v574_v9 = vld [vmem:[#allocation2 + $0x1] ss:$8 sm:$0x3]  ;;  %v4727_v21 = vmov 0.0   ;;  %s3431_s16 = smov 112  }
  0x8b   : > { %p423_p5 = scmp.lt.s32.totalorder %s2541_s21, 7  ;;  %v3657_v1 = vshrl.u32 %v547_v0, 7  ;;  %v627_v39 = vld [vmem:[#allocation2 + $0x2] ss:$8 sm:$0x3]  ;;  %v3766_v44 = vand.u32 127, %v547_v0 }
  0x8c   : > { %s3432_s26 = smov 96  }
  0x8d   : > { %s4795_s21 = smov (!%p423_p5, %s2541_s21), 7  ;;  %v3662_v2 = vsub.s32 0, %v3657_v1  ;;  %v3665_v3 = vsub.s32 1, %v3657_v1 }
  0x8e   : > { %s2592_s11 = sshll.u32 %s4795_s21, 4  ;;  %s2545_s27 = sshll.u32 %s4795_s21, 3 }
  0x8f   : > { %s3671_s15 = scalar_lea.vmem %s4712_s0, %s2592_s11  ;;  %v550_v7 = vrot.slane %v545_v6, %v3662_v2  ;;  %v554_v8 = vrot.slane %v545_v6, %v3665_v3  ;;  %v579_v12 = vrot.slane %v574_v9, %v3662_v2  ;;  %v583_v13 = vrot.slane %v574_v9, %v3665_v3  ;;  %s433_s30 = scalar_lea.vmem %s4722_s10, %s2545_s27 }
  0x90   : > { %v3674_v4 = vld [vmem:[%s3671_s15] sm:$0xff]  ;;  %v3677_v5 = vld [vmem:[%s3671_s15 + $0x8] sm:$0xff]  ;;  %v3682_v10 = vld [vmem:[%s3671_s15 + $0x10] sm:$0xff]  ;;  %v636_v40 = vrot.slane %v627_v39, %v3665_v3  ;;  %v632_v41 = vrot.slane %v627_v39, %v3662_v2 }
  0x91   : > { %v3685_v11 = vld [vmem:[%s3671_s15 + $0x18] sm:$0xff]  ;;  %v3690_v14 = vsub.f32 %v3674_v4, %v550_v7  ;;  %v3693_v15 = vsub.f32 %v3677_v5, %v554_v8  ;;  %v3696_v16 = vsub.f32 %v3682_v10, %v550_v7  ;;  %v3702_v18 = vld [vmem:[%s3671_s15 + $0x20] sm:$0xff]  ;;  %vm586_vm0 = vcmp.lt.f32.partialorder %v3674_v4, %v579_v12  ;;  %v3707_v19 = vld [vmem:[%s3671_s15 + $0x28] sm:$0xff] }
  0x92   : > { %v3699_v17 = vsub.f32 %v3685_v11, %v554_v8  ;;  %vm587_vm1 = vcmp.lt.f32.partialorder %v3677_v5, %v583_v13  ;;  %vm588_vm4 = vcmp.lt.f32.partialorder %v3682_v10, %v579_v12  ;;  %vm589_vm8 = vcmp.lt.f32.partialorder %v3685_v11, %v583_v13  ;;  %v3724_v24 = vld [vmem:[%s3671_s15 + $0x30] sm:$0xff]  ;;  %v3727_v25 = vld [vmem:[%s3671_s15 + $0x38] sm:$0xff] }
  0x93   : > { %vm565_vm2 = vcmp.ge.f32.partialorder %v3690_v14, 0.0  ;;  %vm566_vm3 = vcmp.ge.f32.partialorder %v3693_v15, 0.0  ;;  %vm567_vm6 = vcmp.ge.f32.partialorder %v3696_v16, 0.0  ;;  %v3716_v20 = vsub.f32 %v3702_v18, %v550_v7 }
  0x94   : > { %vm594_vm5 = vmand %vm565_vm2, %vm586_vm0  ;;  %vm568_vm7 = vcmp.ge.f32.partialorder %v3699_v17, 0.0  ;;  %v3720_v23 = vsub.f32 %v3707_v19, %v554_v8  ;;  %vm590_vm10 = vcmp.lt.f32.partialorder %v3702_v18, %v579_v12  ;;  %vm591_vm13 = vcmp.lt.f32.partialorder %v3707_v19, %v583_v13 }
  0x95   : > { %vm595_vm9 = vmand %vm566_vm3, %vm587_vm1  ;;  %v2546_v22 = vsel %vm594_vm5, 1.0, %v4727_v21  ;;  %vm569_vm12 = vcmp.ge.f32.partialorder %v3716_v20, 0.0  ;;  %v3738_v30 = vsub.f32 %v3724_v24, %v550_v7  ;;  %v3741_v31 = vsub.f32 %v3727_v25, %v554_v8 }
  0x96   : > { %v2547_v26 = vsel %vm595_vm9, 1.0, %v4727_v21  ;;  %vm596_vm11 = vmand %vm567_vm6, %vm588_vm4  ;;  %vm570_vm15 = vcmp.ge.f32.partialorder %v3720_v23, 0.0  ;;  %vm592_vm2 = vcmp.lt.f32.partialorder %v3724_v24, %v579_v12  ;;  %vm593_vm3 = vcmp.lt.f32.partialorder %v3727_v25, %v583_v13 }
  0x97   : > { %v3149_v27 = vpack.i.bf16 %v2547_v26, %v2546_v22  ;;  %vm597_vm14 = vmand %vm568_vm7, %vm589_vm8  ;;  %v2548_v28 = vsel %vm596_vm11, 1.0, %v4727_v21  ;;  %vm571_vm4 = vcmp.ge.f32.partialorder %v3738_v30, 0.0  ;;  %vm572_vm5 = vcmp.ge.f32.partialorder %v3741_v31, 0.0 }
  0x98   : > { %v2549_v29 = vsel %vm597_vm14, 1.0, %v4727_v21  ;;  %vm598_vm0 = vmand %vm569_vm12, %vm590_vm10  ;;  %v618_v42 = vmul.f32 2.4999995, %v3690_v14  ;;  %v619_v43 = vmul.f32 2.4999995, %v3693_v15  ;;  %v640_v46 = vsub.f32 %v636_v40, %v3677_v5 }
  0x99   : > { %3150 = vrot.lane.b32.xlu0 %v3149_v27, %s3431_s16  ;;  %v3154_v32 = vpack.i.bf16 %v2549_v29, %v2548_v28  ;;  %vm599_vm1 = vmand %vm570_vm15, %vm591_vm13  ;;  %v2550_v33 = vsel %vm598_vm0, 1.0, %v4727_v21  ;;  %v622_v45 = vmul.f32 2.4999995, %v3716_v20  ;;  %v639_v47 = vsub.f32 %v632_v41, %v3674_v4 }
  0x9a   : > { %v2551_v34 = vsel %vm599_vm1, 1.0, %v4727_v21  ;;  %vm600_vm6 = vmand %vm571_vm4, %vm592_vm2  ;;  %v623_v48 = vmul.f32 2.4999995, %v3720_v23  ;;  %v621_v49 = vmul.f32 2.4999995, %v3699_v17  ;;  %v642_v50 = vsub.f32 %v636_v40, %v3685_v11 }
  0x9b   : > { %v3159_v35 = vpack.i.bf16 %v2551_v34, %v2550_v33  ;;  %vm601_vm7 = vmand %vm572_vm5, %vm593_vm3  ;;  %v3751_v36 = vsel %vm600_vm6, 1.0, %v4727_v21  ;;  %v620_v51 = vmul.f32 2.4999995, %v3696_v16  ;;  %v641_v52 = vsub.f32 %v632_v41, %v3682_v10 }
  0x9c   : > { %v3756_v37 = vsel %vm601_vm7, 1.0, %v4727_v21  ;;  %vm673_vm8 = vcmp.lt.s32.totalorder %v3766_v44, 112  ;;  %v683_v53 = vmul.f32 %v2547_v26, %v619_v43  ;;  %v682_v54 = vmul.f32 %v2546_v22, %v618_v42 }
  0x9d   : > { %3155 = vrot.lane.b32.xlu0 %v3154_v32, %s3431_s16  ;;  %3160 = vrot.lane.b32.xlu1 %v3159_v35, %s3431_s16  ;;  %v3164_v38 = vpack.i.bf16 %v3756_v37, %v3751_v36  ;;  %v644_v55 = vsub.f32 %v636_v40, %v3707_v19  ;;  %v686_v56 = vmul.f32 %v2550_v33, %v622_v45  ;;  %v648_v58 = vmul.f32 2.4999995, %v640_v46 }
  0x9e   : > { %v647_v59 = vmul.f32 2.4999995, %v639_v47  ;;  %v643_v60 = vsub.f32 %v632_v41, %v3702_v18  ;;  %v687_v61 = vmul.f32 %v2551_v34, %v623_v48  ;;  %v685_v0 = vmul.f32 %v2549_v29, %v621_v49 }
  0x9f   : > { %v650_v6 = vmul.f32 2.4999995, %v642_v50  ;;  %v649_v7 = vmul.f32 2.4999995, %v641_v52  ;;  %v684_v8 = vmul.f32 %v2548_v28, %v620_v51  ;;  %v646_v9 = vsub.f32 %v636_v40, %v3727_v25 }
  0xa0   : > { %v652_v22 = vmul.f32 2.4999995, %v644_v55  ;;  %v625_v26 = vmul.f32 2.4999995, %v3741_v31  ;;  %v651_v35 = vmul.f32 2.4999995, %v643_v60  ;;  %v645_v29 = vsub.f32 %v632_v41, %v3724_v24 }
  0xa1   : > { %3165 = vrot.lane.b32.xlu1 %v3164_v38, %s3431_s16  ;;  %v654_v45 = vmul.f32 2.4999995, %v646_v9  ;;  %v624_v46 = vmul.f32 2.4999995, %v3738_v30  ;;  %vm1074_vm9 = vcmask 130048  }
 0x10b   : > { %v3151_v57 = vpop.permute.xlu0 %3150 }
 0x10c   : > { %v3153_v62 = vunpack.i.h.bf16 %v3151_v57  ;;  %v3152_v63 = vunpack.i.l.bf16 %v3151_v57 }
 0x10e   : > { %v674_v12 = vsel %vm673_vm8, %v3152_v63, %v3153_v62  ;;  %v678_v13 = vsel %vm673_vm8, %v3153_v62, %v3152_v63  ;;  %v689_v62 = vmul.f32 %v3756_v37, %v625_v26 }
 0x10f   : > { %v3156_v27 = vpop.permute.xlu0 %3155  ;;  %v3161_v32 = vpop.permute.xlu1 %3160  ;;  %v691_v33 = vmul.f32 %v678_v13, %v648_v58  ;;  %v690_v34 = vmul.f32 %v674_v12, %v647_v59  ;;  %v453_v13 = vld [vmem:[#allocation6 + $0x20] sm:$0xff] }
 0x110   : > { %v3158_v38 = vunpack.i.h.bf16 %v3156_v27  ;;  %v3157_v28 = vunpack.i.l.bf16 %v3156_v27  ;;  %v3163_v39 = vunpack.i.h.bf16 %v3161_v32  ;;  %v3162_v40 = vunpack.i.l.bf16 %v3161_v32  ;;  %v452_v27 = vld [vmem:[#allocation6 + $0x18] sm:$0xff] }
 0x111   : > { %v3786_v42 = vadd.f32 %v691_v33, %v683_v53  ;;  %v3788_v43 = vadd.f32 %v690_v34, %v682_v54  ;;  %v653_v54 = vmul.f32 2.4999995, %v645_v29  ;;  %v456_v32 = vld [vmem:[#allocation6 + $0x38] sm:$0xff]  ;;  %v462_v29 = vld [vmem:[#allocation6 + $0x68] sm:$0xff] }
 0x112   : > { %v675_v47 = vsel %vm673_vm8, %v3157_v28, %v3158_v38  ;;  %v679_v48 = vsel %vm673_vm8, %v3158_v38, %v3157_v28  ;;  %v676_v41 = vsel %vm673_vm8, %v3162_v40, %v3163_v39  ;;  %v680_v49 = vsel %vm673_vm8, %v3163_v39, %v3162_v40  ;;  %v465_v38 = vld [vmem:[#allocation6 + $0x80] sm:$0xff] }
 0x113   : > { %751 = vrot.lane.b32.xlu1 %v3786_v42, %s3431_s16  ;;  %743 = vrot.lane.b32.xlu0 %v3788_v43, %s3431_s16  ;;  %v3166_v50 = vpop.permute.xlu1 %3165  ;;  %v693_v51 = vmul.f32 %v679_v48, %v650_v6  ;;  %v692_v52 = vmul.f32 %v675_v47, %v649_v7  ;;  %v695_v53 = vmul.f32 %v680_v49, %v652_v22  ;;  %v449_v22 = vld [vmem:[#allocation6] sm:$0xff]  ;;  %v468_v47 = vld [vmem:[#allocation6 + $0x98] sm:$0xff]  ;;  %v471_v48 = vld [vmem:[#allocation6 + $0xb0] sm:$0xff] }
 0x114   : > { %v3168_v55 = vunpack.i.h.bf16 %v3166_v50  ;;  %v3167_v57 = vunpack.i.l.bf16 %v3166_v50  ;;  %v694_v58 = vmul.f32 %v676_v41, %v651_v35  ;;  %v688_v6 = vmul.f32 %v3751_v36, %v624_v46  ;;  %v455_v36 = vld [vmem:[#allocation6 + $0x30] sm:$0xff]  ;;  %v458_v35 = vld [vmem:[#allocation6 + $0x48] sm:$0xff]  ;;  %v464_v46 = vld [vmem:[#allocation6 + $0x78] sm:$0xff] }
 0x115   : > { %v3803_v59 = vadd.f32 %v693_v51, %v685_v0  ;;  %v3805_v60 = vadd.f32 %v692_v52, %v684_v8  ;;  %v3812_v12 = vadd.f32 %v695_v53, %v687_v61  ;;  %v450_v8 = vld [vmem:[#allocation6 + $0x8] sm:$0xff]  ;;  %v459_v61 = vld [vmem:[#allocation6 + $0x50] sm:$0xff]  ;;  %v2853_v33 = vpack.c.bf16 %v452_v27, %v449_v22  ;;  %v477_v53 = vld [vmem:[#allocation6 + $0xe0] sm:$0xff] }
 0x116   : > { %v677_v63 = vsel %vm673_vm8, %v3167_v57, %v3168_v55  ;;  %v681_v9 = vsel %vm673_vm8, %v3168_v55, %v3167_v57  ;;  %v3819_v0 = vadd.f32 %v694_v58, %v686_v56  ;;  %v2851_v26 = vpack.c.bf16 %v453_v13, %v450_v8  ;;  %v467_v50 = vld [vmem:[#allocation6 + $0x90] sm:$0xff]  ;;  %v470_v51 = vld [vmem:[#allocation6 + $0xa8] sm:$0xff]  ;;  %v505_v22 = vld [vmem:[#allocation6 + $0x1c0] sm:$0xff] }
 0x117   : > { %753 = vrot.lane.b32.xlu1 %v3803_v59, %s3431_s16  ;;  %745 = vrot.lane.b32.xlu0 %v3805_v60, %s3431_s16  ;;  %v697_v7 = vmul.f32 %v681_v9, %v654_v45  ;;  %v696_v37 = vmul.f32 %v677_v63, %v653_v54  ;;  %v2855_v34 = vpack.c.bf16 %v459_v61, %v456_v32  ;;  %v461_v45 = vld [vmem:[#allocation6 + $0x60] sm:$0xff]  ;;  %v474_v52 = vld [vmem:[#allocation6 + $0xc8] sm:$0xff]  ;;  %v499_v54 = vld [vmem:[#allocation6 + $0x190] sm:$0xff] }
 0x118   : > { %2852 = vmatprep.subr.bf16.mxu0 %v2851_v26  ;;  %v2857_v39 = vpack.c.bf16 %v458_v35, %v455_v36  ;;  %v2859_v40 = vpack.c.bf16 %v465_v38, %v462_v29  ;;  %v2861_v41 = vpack.c.bf16 %v464_v46, %v461_v45  ;;  %v2863_v49 = vpack.c.bf16 %v471_v48, %v468_v47  ;;  %v502_v55 = vld [vmem:[#allocation6 + $0x1a8] sm:$0xff]  ;;  %v451_v57 = vld [vmem:[#allocation6 + $0x10] sm:$0xff]  ;;  %v476_v63 = vld [vmem:[#allocation6 + $0xd8] sm:$0xff] }
 0x119   : > { %v3825_v56 = vadd.f32 %v697_v7, %v689_v62  ;;  %v3827_v28 = vadd.f32 %v696_v37, %v688_v6  ;;  %2854 = vmatpush1.bf16.msra.mxu0 %v2853_v33  ;;  %v2865_v58 = vpack.c.bf16 %v470_v51, %v467_v50  ;;  %v473_v62 = vld [vmem:[#allocation6 + $0xc0] sm:$0xff]  ;;  %v2915_v9 = vpack.c.bf16 %v502_v55, %v499_v54  ;;  %v454_v6 = vld [vmem:[#allocation6 + $0x28] sm:$0xff]  ;;  %v480_v37 = vld [vmem:[#allocation6 + $0xf8] sm:$0xff] }
 0x11a   : > { %2856 = vmatprep.subr.bf16.mxu0 %v2855_v34  ;;  %v2867_v7 = vpack.c.bf16 %v477_v53, %v474_v52  ;;  %v483_v8 = vld [vmem:[#allocation6 + $0x110] sm:$0xff]  ;;  %v2917_v13 = vpack.c.bf16 %v454_v6, %v451_v57  ;;  %v508_v26 = vld [vmem:[#allocation6 + $0x1d8] sm:$0xff]  ;;  %v457_v27 = vld [vmem:[#allocation6 + $0x40] sm:$0xff]  ;;  %v2869_v34 = vpack.c.bf16 %v476_v63, %v473_v62 }
 0x11b   : > { %755 = vrot.lane.b32.xlu1 %v3812_v12, %s3431_s16  ;;  %747 = vrot.lane.b32.xlu0 %v3819_v0, %s3431_s16  ;;  %v460_v32 = vld [vmem:[#allocation6 + $0x58] sm:$0xff]  ;;  %v2919_v61 = vpack.c.bf16 %v508_v26, %v505_v22  ;;  %v479_v36 = vld [vmem:[#allocation6 + $0xf0] sm:$0xff]  ;;  %v514_v29 = vld [vmem:[#allocation6 + $0x208] sm:$0xff]  ;;  %v2871_v38 = vpack.c.bf16 %v483_v8, %v480_v37 }
 0x11c   : > { %2916 = vmatprep.subr.bf16.mxu1 %v2915_v9  ;;  %v2921_v33 = vpack.c.bf16 %v460_v32, %v457_v27  ;;  %v511_v35 = vld [vmem:[#allocation6 + $0x1f0] sm:$0xff]  ;;  %v466_v46 = vld [vmem:[#allocation6 + $0x88] sm:$0xff]  ;;  %v489_v48 = vld [vmem:[#allocation6 + $0x140] sm:$0xff] }
 0x11d   : > { %2858 = vmatpush1.bf16.msra.mxu0 %v2857_v39  ;;  %2918 = vmatpush3.bf16.msra.mxu1 %v2917_v13  ;;  %v482_v39 = vld [vmem:[#allocation6 + $0x108] sm:$0xff]  ;;  %v463_v45 = vld [vmem:[#allocation6 + $0x70] sm:$0xff]  ;;  %v520_v50 = vld [vmem:[#allocation6 + $0x238] sm:$0xff] }
 0x11e   : > { %2860 = vmatprep.subr.bf16.mxu0 %v2859_v40  ;;  %2920 = vmatprep.subr.bf16.mxu1 %v2919_v61  ;;  %v2923_v40 = vpack.c.bf16 %v514_v29, %v511_v35  ;;  %v486_v47 = vld [vmem:[#allocation6 + $0x128] sm:$0xff]  ;;  %v2873_v51 = vpack.c.bf16 %v482_v39, %v479_v36  ;;  %v469_v53 = vld [vmem:[#allocation6 + $0xa0] sm:$0xff]  ;;  %v472_v54 = vld [vmem:[#allocation6 + $0xb8] sm:$0xff] }
 0x11f   : > { %757 = vrot.lane.b32.xlu1 %v3825_v56, %s3431_s16  ;;  %749 = vrot.lane.b32.xlu0 %v3827_v28, %s3431_s16  ;;  %v2875_v55 = vpack.c.bf16 %v489_v48, %v486_v47  ;;  %v485_v57 = vld [vmem:[#allocation6 + $0x120] sm:$0xff]  ;;  %v523_v62 = vld [vmem:[#allocation6 + $0x250] sm:$0xff]  ;;  %v492_v63 = vld [vmem:[#allocation6 + $0x158] sm:$0xff] }
 0x120   : > { %v495_v9 = vld [vmem:[#allocation6 + $0x170] sm:$0xff]  ;;  %v526_v6 = vld [vmem:[#allocation6 + $0x268] sm:$0xff]  ;;  %v529_v61 = vld [vmem:[#allocation6 + $0x280] sm:$0xff] }
 0x121   : > { %2862 = vmatpush1.bf16.msra.mxu0 %v2861_v41  ;;  %2922 = vmatpush3.bf16.msra.mxu1 %v2921_v33  ;;  %v2925_v41 = vpack.c.bf16 %v466_v46, %v463_v45  ;;  %v491_v8 = vld [vmem:[#allocation6 + $0x150] sm:$0xff]  ;;  %v2931_v13 = vpack.c.bf16 %v526_v6, %v523_v62  ;;  %v478_v26 = vld [vmem:[#allocation6 + $0xe8] sm:$0xff]  ;;  %v2879_v27 = vpack.c.bf16 %v495_v9, %v492_v63  ;;  %v532_v33 = vld [vmem:[#allocation6 + $0x298] sm:$0xff] }
 0x122   : > { %2864 = vmatprep.subr.bf16.mxu0 %v2863_v49  ;;  %v517_v49 = vld [vmem:[#allocation6 + $0x220] sm:$0xff]  ;;  %2924 = vmatprep.subr.bf16.mxu1 %v2923_v40  ;;  %v475_v22 = vld [vmem:[#allocation6 + $0xd0] sm:$0xff]  ;;  %v494_v32 = vld [vmem:[#allocation6 + $0x168] sm:$0xff]  ;;  %v2935_v39 = vpack.c.bf16 %v532_v33, %v529_v61 }
 0x123   : > { %v2927_v52 = vpack.c.bf16 %v520_v50, %v517_v49  ;;  %v501_v36 = vld [vmem:[#allocation6 + $0x1a0] sm:$0xff]  ;;  %v2933_v35 = vpack.c.bf16 %v478_v26, %v475_v22  ;;  %v2881_v29 = vpack.c.bf16 %v494_v32, %v491_v8  ;;  %v484_v45 = vld [vmem:[#allocation6 + $0x118] sm:$0xff]  ;;  %v535_v48 = vld [vmem:[#allocation6 + $0x2b0] sm:$0xff] }
 0x124   : > { %v481_v40 = vld [vmem:[#allocation6 + $0x100] sm:$0xff]  ;;  %v500_v47 = vld [vmem:[#allocation6 + $0x198] sm:$0xff]  ;;  %v507_v50 = vld [vmem:[#allocation6 + $0x1d0] sm:$0xff] }
 0x125   : > { %2866 = vmatpush1.bf16.msra.mxu0 %v2865_v58  ;;  %v488_v58 = vld [vmem:[#allocation6 + $0x138] sm:$0xff]  ;;  %2926 = vmatpush3.bf16.msra.mxu1 %v2925_v41  ;;  %v538_v41 = vld [vmem:[#allocation6 + $0x2c8] sm:$0xff]  ;;  %v513_v9 = vld [vmem:[#allocation6 + $0x200] sm:$0xff] }
 0x126   : > { %2868 = vmatprep.subr.bf16.mxu0 %v2867_v7  ;;  %v2929_v7 = vpack.c.bf16 %v472_v54, %v469_v53  ;;  %v2877_v37 = vpack.c.bf16 %v488_v58, %v485_v57  ;;  %2928 = vmatprep.subr.bf16.mxu1 %v2927_v52  ;;  %v504_v49 = vld [vmem:[#allocation6 + $0x1b8] sm:$0xff]  ;;  %v2939_v53 = vpack.c.bf16 %v538_v41, %v535_v48  ;;  %v487_v54 = vld [vmem:[#allocation6 + $0x130] sm:$0xff]  ;;  %v506_v62 = vld [vmem:[#allocation6 + $0x1c8] sm:$0xff] }
 0x127   : > { %v2887_v57 = vpack.c.bf16 %v507_v50, %v504_v49  ;;  %v503_v58 = vld [vmem:[#allocation6 + $0x1b0] sm:$0xff]  ;;  %v510_v63 = vld [vmem:[#allocation6 + $0x1e8] sm:$0xff]  ;;  %v509_v8 = vld [vmem:[#allocation6 + $0x1e0] sm:$0xff] }
 0x128   : > { %v516_v22 = vld [vmem:[#allocation6 + $0x218] sm:$0xff]  ;;  %v519_v26 = vld [vmem:[#allocation6 + $0x230] sm:$0xff]  ;;  %v518_v33 = vld [vmem:[#allocation6 + $0x228] sm:$0xff] }
 0x129   : > { %2870 = vmatpush1.bf16.msra.mxu0 %v2869_v34  ;;  %v498_v34 = vld [vmem:[#allocation6 + $0x188] sm:$0xff]  ;;  %2930 = vmatpush3.bf16.msra.mxu1 %v2929_v7  ;;  %v2889_v7 = vpack.c.bf16 %v506_v62, %v503_v58  ;;  %v2895_v32 = vpack.c.bf16 %v519_v26, %v516_v22  ;;  %v515_v61 = vld [vmem:[#allocation6 + $0x210] sm:$0xff]  ;;  %v537_v50 = vld [vmem:[#allocation6 + $0x2c0] sm:$0xff] }
 0x12a   : > { %2872 = vmatprep.subr.bf16.mxu0 %v2871_v38  ;;  %v497_v38 = vld [vmem:[#allocation6 + $0x180] sm:$0xff]  ;;  %2932 = vmatprep.subr.bf16.mxu1 %v2931_v13  ;;  %v2883_v46 = vpack.c.bf16 %v501_v36, %v498_v34  ;;  %v512_v13 = vld [vmem:[#allocation6 + $0x1f8] sm:$0xff]  ;;  %v522_v34 = vld [vmem:[#allocation6 + $0x248] sm:$0xff] }
 0x12b   : > { %v2885_v52 = vpack.c.bf16 %v500_v47, %v497_v38  ;;  %v525_v36 = vld [vmem:[#allocation6 + $0x260] sm:$0xff]  ;;  %v527_v48 = vld [vmem:[#allocation6 + $0x270] sm:$0xff]  ;;  %v530_v41 = vld [vmem:[#allocation6 + $0x288] sm:$0xff] }
 0x12c   : > { %v521_v38 = vld [vmem:[#allocation6 + $0x240] sm:$0xff]  ;;  %v534_v49 = vld [vmem:[#allocation6 + $0x2a8] sm:$0xff] }
 0x12d   : > { %2874 = vmatpush1.bf16.msra.mxu0 %v2873_v51  ;;  %2934 = vmatpush3.bf16.msra.mxu1 %v2933_v35  ;;  %v2937_v51 = vpack.c.bf16 %v484_v45, %v481_v40  ;;  %v2897_v35 = vpack.c.bf16 %v518_v33, %v515_v61  ;;  %v528_v40 = vld [vmem:[#allocation6 + $0x278] sm:$0xff]  ;;  %v531_v45 = vld [vmem:[#allocation6 + $0x290] sm:$0xff]  ;;  %v541_v22 = vld [vmem:[#allocation6 + $0x2e0] sm:$0xff] }
 0x12e   : > { %2876 = vmatprep.subr.bf16.mxu0 %v2875_v55  ;;  %2936 = vmatprep.subr.bf16.mxu1 %v2935_v39  ;;  %v490_v55 = vld [vmem:[#allocation6 + $0x148] sm:$0xff]  ;;  %v524_v39 = vld [vmem:[#allocation6 + $0x258] sm:$0xff]  ;;  %v2903_v47 = vpack.c.bf16 %v531_v45, %v528_v40  ;;  %v493_v33 = vld [vmem:[#allocation6 + $0x160] sm:$0xff] }
 0x12f   : > { %v2941_v6 = vpack.c.bf16 %v490_v55, %v487_v54  ;;  %v536_v54 = vld [vmem:[#allocation6 + $0x2b8] sm:$0xff] }
 0x130   : > { %v544_v61 = vld [vmem:[#allocation6 + $0x2f8] sm:$0xff] }
 0x131   : > { %2878 = vmatpush1.bf16.msra.mxu0 %v2877_v37  ;;  %2938 = vmatpush3.bf16.msra.mxu1 %v2937_v51  ;;  %v2891_v37 = vpack.c.bf16 %v513_v9, %v510_v63  ;;  %v2905_v51 = vpack.c.bf16 %v530_v41, %v527_v48  ;;  %v444_v45 = vld [vmem:[#allocation4 + $0x8] sm:$0xff]  ;;  %v708_v48 = vmul.f32 1.2499998, %v3696_v16 }
 0x132   : > { %2880 = vmatprep.subr.bf16.mxu0 %v2879_v27  ;;  %2940 = vmatprep.subr.bf16.mxu1 %v2939_v53  ;;  %v2893_v27 = vpack.c.bf16 %v512_v13, %v509_v8  ;;  %v533_v53 = vld [vmem:[#allocation6 + $0x2a0] sm:$0xff]  ;;  %v539_v8 = vld [vmem:[#allocation6 + $0x2d0] sm:$0xff]  ;;  %v542_v13 = vld [vmem:[#allocation6 + $0x2e8] sm:$0xff] }
 0x133   : > { %v2909_v55 = vpack.c.bf16 %v536_v54, %v533_v53  ;;  %v445_v54 = vld [vmem:[#allocation4 + $0x10] sm:$0xff] }
 0x135   : > { %2882 = vmatpush1.bf16.msra.mxu0 %v2881_v29  ;;  %2942 = vmatpush3.bf16.msra.mxu1 %v2941_v6  ;;  %v2899_v29 = vpack.c.bf16 %v525_v36, %v522_v34  ;;  %v540_v6 = vld [vmem:[#allocation6 + $0x2d8] sm:$0xff]  ;;  %v707_v36 = vmul.f32 1.2499998, %v3693_v15 }
 0x136   : > { %2884 = vmatprep.subr.bf16.mxu0 %v2883_v46  ;;  %v2901_v46 = vpack.c.bf16 %v524_v39, %v521_v38  ;;  %v496_v34 = vld [vmem:[#allocation6 + $0x178] sm:$0xff] }
 0x137   : > { %v2945_v38 = vpack.c.bf16 %v496_v34, %v493_v33 }
 0x139   : > { %2886 = vmatpush1.bf16.msra.mxu0 %v2885_v52  ;;  %v2907_v52 = vpack.c.bf16 %v537_v50, %v534_v49 }
 0x13a   : > { %2888 = vmatprep.subr.bf16.mxu0 %v2887_v57  ;;  %v715_v57 = vld [vmem:[#allocation2 + $0x3] ss:$8 sm:$0x3] }
 0x13b   : > { %v3834_v58 = vrot.slane %v715_v57, %v3662_v2  ;;  %v3837_v62 = vrot.slane %v715_v57, %v3665_v3 }
 0x13d   : > { %2890 = vmatpush1.bf16.msra.mxu0 %v2889_v7  ;;  %v727_v63 = vsub.f32 %v3834_v58, %v3674_v4  ;;  %v728_v9 = vsub.f32 %v3837_v62, %v3677_v5  ;;  %v543_v7 = vld [vmem:[#allocation6 + $0x2f0] sm:$0xff]  ;;  %v729_v26 = vsub.f32 %v3834_v58, %v3682_v10  ;;  %v731_v53 = vsub.f32 %v3834_v58, %v3702_v18 }
 0x13e   : > { %2892 = vmatprep.subr.bf16.mxu0 %v2891_v37  ;;  %v2911_v37 = vpack.c.bf16 %v543_v7, %v540_v6 }
 0x13f   : > { %v735_v39 = vmul.f32 1.2499998, %v727_v63  ;;  %v736_v40 = vmul.f32 1.2499998, %v728_v9  ;;  %v732_v9 = vsub.f32 %v3837_v62, %v3707_v19  ;;  %v739_v34 = vmul.f32 1.2499998, %v731_v53 }
 0x141   : > { %2894 = vmatpush1.bf16.msra.mxu0 %v2893_v27  ;;  %v730_v27 = vsub.f32 %v3837_v62, %v3685_v11 }
 0x142   : > { %2896 = vmatprep.subr.bf16.mxu0 %v2895_v32  ;;  %v2913_v32 = vpack.c.bf16 %v542_v13, %v539_v8  ;;  %v768_v8 = vmul.f32 %v707_v36, %v3786_v42 }
 0x145   : > { %2898 = vmatpush1.bf16.msra.mxu0 %v2897_v35  ;;  %v706_v35 = vmul.f32 1.2499998, %v3690_v14 }
 0x146   : > { %2900 = vmatprep.subr.bf16.mxu0 %v2899_v29  ;;  %v2943_v29 = vpack.c.bf16 %v544_v61, %v541_v22  ;;  %v711_v22 = vmul.f32 1.2499998, %v3720_v23 }
 0x147   : > { %v767_v13 = vmul.f32 %v706_v35, %v3788_v43  ;;  %v734_v35 = vsub.f32 %v3837_v62, %v3727_v25  ;;  %v712_v62 = vmul.f32 1.2499998, %v3738_v30 }
 0x148   : > { %2944 = vmatprep.subr.bf16.mxu1 %v2943_v29  ;;  %v733_v29 = vsub.f32 %v3834_v58, %v3724_v24  ;;  %v740_v58 = vmul.f32 1.2499998, %v732_v9 }
 0x149   : > { %2902 = vmatpush1.bf16.msra.mxu0 %v2901_v46  ;;  %v447_v46 = vld [vmem:[#allocation4 + $0x20] sm:$0xff]  ;;  %2946 = vmatpush3.bf16.msra.mxu1 %v2945_v38  ;;  %v742_v53 = vmul.f32 1.2499998, %v734_v35 }
 0x14a   : > { %2904 = vmatprep.subr.bf16.mxu0 %v2903_v47  ;;  %v709_v47 = vmul.f32 1.2499998, %v3699_v17  ;;  %v2947_v41 = vpack.c.bf16 %v447_v46, %v444_v45 }
 0x14c   : > { %v770_v36 = vmul.f32 %v709_v47, %v3803_v59  ;;  %v713_v59 = vmul.f32 1.2499998, %v3741_v31 }
 0x14d   : > { %2906 = vmatpush1.bf16.msra.mxu0 %v2905_v51  ;;  %v737_v51 = vmul.f32 1.2499998, %v729_v26  ;;  %v710_v26 = vmul.f32 1.2499998, %v3716_v20 }
 0x14e   : > { %2908 = vmatprep.subr.bf16.mxu0 %v2907_v52  ;;  %v738_v52 = vmul.f32 1.2499998, %v730_v27 }
 0x151   : > { %2910 = vmatpush1.bf16.msra.mxu0 %v2909_v55  ;;  %v448_v55 = vld [vmem:[#allocation4 + $0x28] sm:$0xff] }
 0x152   : > { %2912 = vmatprep.subr.bf16.mxu0 %v2911_v37  ;;  %v3859_v6 = vpack.c.bf16 %v448_v55, %v445_v54  ;;  %v771_v54 = vmul.f32 %v710_v26, %v3819_v0  ;;  %v773_v0 = vmul.f32 %v712_v62, %v3827_v28  ;;  %v879_v28 = vsub.f32 0.0, %v3724_v24 }
 0x153   : > { %v791_v62 = vmul.f32 0.83333313, %v3690_v14 }
 0x154   : > { %2952 = vmatprep.subr.bf16.mxu1 %v3859_v6 }
 0x155   : > { %2914 = vmatpush1.bf16.msra.mxu0 %v2913_v32 }
 0x156   : > { %2948 = vmatprep.subr.bf16.mxu0 %v2947_v41 }
 0x185   : > { %v752_v49 = vpop.permute.xlu1 %751  ;;  %v744_v50 = vpop.permute.xlu0 %743 }
 0x186   : > { %v759_v57 = vsel %vm673_vm8, %v744_v50, %v752_v49  ;;  %v763_v63 = vsel %vm673_vm8, %v752_v49, %v744_v50 }
 0x187   : > { %v775_v7 = vmul.f32 %v759_v57, %v735_v39  ;;  %v776_v37 = vmul.f32 %v763_v63, %v736_v40  ;;  %v769_v40 = vmul.f32 %v708_v48, %v3805_v60 }
 0x189   : > { %v754_v27 = vpop.permute.xlu1 %753  ;;  %v746_v32 = vpop.permute.xlu0 %745  ;;  %v3866_v61 = vadd.f32 %v776_v37, %v768_v8  ;;  %v3868_v33 = vadd.f32 %v775_v7, %v767_v13  ;;  %v774_v37 = vmul.f32 %v713_v59, %v3825_v56  ;;  %v876_v56 = vsub.f32 0.0, %v3674_v4 }
 0x18a   : > { %v760_v42 = vsel %vm673_vm8, %v746_v32, %v754_v27  ;;  %v764_v43 = vsel %vm673_vm8, %v754_v27, %v746_v32  ;;  %v877_v27 = vsub.f32 0.0, %v3682_v10  ;;  %v792_v59 = vmul.f32 0.83333313, %v3693_v15 }
 0x18b   : > { %v777_v38 = vmul.f32 %v760_v42, %v737_v51  ;;  %v778_v39 = vmul.f32 %v764_v43, %v738_v52  ;;  %836 = vrot.lane.b32.xlu1 %v3866_v61, %s3431_s16  ;;  %828 = vrot.lane.b32.xlu0 %v3868_v33, %s3431_s16  ;;  %v741_v51 = vmul.f32 1.2499998, %v733_v29  ;;  %v772_v52 = vmul.f32 %v711_v22, %v3812_v12  ;;  %v800_v43 = vld [vmem:[#allocation2 + $0x4] ss:$8 sm:$0x3] }
 0x18c   : > { %v880_v32 = vmul.f32 1.442695, %v876_v56  ;;  %v882_v29 = vmul.f32 1.442695, %v877_v27  ;;  %v3927_v35 = vrot.slane %v800_v43, %v3662_v2 }
 0x18d   : > { %v756_v45 = vpop.permute.xlu1 %755  ;;  %v748_v46 = vpop.permute.xlu0 %747  ;;  %v3884_v41 = vadd.f32 %v778_v39, %v770_v36  ;;  %v3886_v49 = vadd.f32 %v777_v38, %v769_v40  ;;  %v886_v36 = vmul.f32 1.442695, %v879_v28  ;;  %v3930_v38 = vrot.slane %v800_v43, %v3665_v3 }
 0x18e   : > { %v761_v47 = vsel %vm673_vm8, %v748_v46, %v756_v45  ;;  %v765_v50 = vsel %vm673_vm8, %v756_v45, %v748_v46  ;;  %3209 = vpow2.f32 %v880_v32  ;;  %v812_v39 = vsub.f32 %v3927_v35, %v3674_v4 }
 0x18f   : > { %v779_v60 = vmul.f32 %v761_v47, %v739_v34  ;;  %v780_v48 = vmul.f32 %v765_v50, %v740_v58  ;;  %838 = vrot.lane.b32.xlu1 %v3884_v41, %s3431_s16  ;;  %830 = vrot.lane.b32.xlu0 %v3886_v49, %s3431_s16  ;;  %v878_v34 = vsub.f32 0.0, %v3702_v18  ;;  %3211 = vpow2.f32 %v882_v29 }
 0x190   : > { %v813_v58 = vsub.f32 %v3930_v38, %v3677_v5  ;;  %v814_v45 = vsub.f32 %v3927_v35, %v3682_v10  ;;  %v815_v46 = vsub.f32 %v3930_v38, %v3685_v11  ;;  %v794_v47 = vmul.f32 0.83333313, %v3699_v17  ;;  %v446_v5 = vld [vmem:[#allocation4 + $0x18] sm:$0xff] }
 0x191   : > { %v758_v55 = vpop.permute.xlu1 %757  ;;  %v750_v57 = vpop.permute.xlu0 %749  ;;  %v3900_v63 = vadd.f32 %v780_v48, %v772_v52  ;;  %v3902_v9 = vadd.f32 %v779_v60, %v771_v54  ;;  %v884_v42 = vmul.f32 1.442695, %v878_v34  ;;  %v793_v50 = vmul.f32 0.83333313, %v3696_v16  ;;  %v443_v60 = vld [vmem:[#allocation4] sm:$0xff] }
 0x192   : > { %v762_v12 = vsel %vm673_vm8, %v750_v57, %v758_v55  ;;  %v766_v7 = vsel %vm673_vm8, %v758_v55, %v750_v57  ;;  %v820_v4 = vmul.f32 0.83333313, %v812_v39  ;;  %v821_v52 = vmul.f32 0.83333313, %v813_v58 }
 0x193   : > { %v781_v8 = vmul.f32 %v762_v12, %v741_v51  ;;  %v782_v13 = vmul.f32 %v766_v7, %v742_v53  ;;  %840 = vrot.lane.b32.xlu1 %v3900_v63, %s3431_s16  ;;  %832 = vrot.lane.b32.xlu0 %v3902_v9, %s3431_s16  ;;  %3213 = vpow2.f32 %v884_v42  ;;  %v816_v48 = vsub.f32 %v3927_v35, %v3702_v18 }
 0x194   : > { %3215 = vpow2.f32 %v886_v36  ;;  %v817_v10 = vsub.f32 %v3930_v38, %v3707_v19  ;;  %v796_v11 = vmul.f32 0.83333313, %v3720_v23  ;;  %v822_v17 = vmul.f32 0.83333313, %v814_v45 }
 0x195   : > { %v3914_v22 = vadd.f32 %v782_v13, %v774_v37  ;;  %v3916_v26 = vadd.f32 %v781_v8, %v773_v0  ;;  %v823_v55 = vmul.f32 0.83333313, %v815_v46  ;;  %v795_v16 = vmul.f32 0.83333313, %v3716_v20 }
 0x196   : > { %v2949_v18 = vpack.c.bf16 %v446_v5, %v443_v60  ;;  %v853_v23 = vmul.f32 %v792_v59, %v3866_v61  ;;  %v852_v8 = vmul.f32 %v791_v62, %v3868_v33  ;;  %v824_v0 = vmul.f32 0.83333313, %v816_v48 }
 0x197   : > { %842 = vrot.lane.b32.xlu1 %v3914_v22, %s3431_s16  ;;  %834 = vrot.lane.b32.xlu0 %v3916_v26, %s3431_s16  ;;  %v825_v56 = vmul.f32 0.83333313, %v817_v10  ;;  %v818_v28 = vsub.f32 %v3927_v35, %v3724_v24  ;;  %v819_v42 = vsub.f32 %v3930_v38, %v3727_v25  ;;  %v855_v43 = vmul.f32 %v794_v47, %v3884_v41 }
 0x198   : > { %v3210_v40 = vpop.eup %3209  ;;  %v854_v58 = vmul.f32 %v793_v50, %v3886_v49  ;;  %v798_v24 = vmul.f32 0.83333313, %v3741_v31  ;;  %v797_v46 = vmul.f32 0.83333313, %v3738_v30  ;;  %v857_v31 = vmul.f32 %v796_v11, %v3900_v63 }
 0x199   : > { %v3212_v51 = vpop.eup %3211  ;;  %v888_v15 = vadd.f32 1.0, %v3210_v40  ;;  %v826_v45 = vmul.f32 0.83333313, %v818_v28  ;;  %v827_v62 = vmul.f32 0.83333313, %v819_v42 }
 0x19a   : > { %v889_v7 = vadd.f32 1.0, %v3212_v51  ;;  %v859_v48 = vmul.f32 %v798_v24, %v3914_v22  ;;  %v3258_v22 = vld [vmem:[%s3671_s15 + $0x10] sm:$0xff] }
 0x19b   : > { %3217 = vrcp.f32 %v888_v15  ;;  %v1355_v28 = vld [vmem:[#allocation7 + $0x1] ss:$8 sm:$0x7] }
 0x19c   : > { %3219 = vrcp.f32 %v889_v7 }
 0x19d   : > { %v3214_v53 = vpop.eup %3213 }
 0x19e   : > { %v3216_v13 = vpop.eup %3215  ;;  %v890_v27 = vadd.f32 1.0, %v3214_v53 }
 0x19f   : > { %v891_v40 = vadd.f32 1.0, %v3216_v13 }
 0x1a0   : > { %3221 = vrcp.f32 %v890_v27 }
 0x1a1   : > { %3223 = vrcp.f32 %v891_v40 }
 0x1a5   : > { %v3218_v60 = vpop.eup %3217 }
 0x1a6   : > { %v3220_v15 = vpop.eup %3219 }
 0x1fd   : > { %v837_v14 = vpop.permute.xlu1 %836  ;;  %v829_v54 = vpop.permute.xlu0 %828 }
 0x1fe   : > { %v844_v57 = vsel %vm673_vm8, %v829_v54, %v837_v14  ;;  %v848_v12 = vsel %vm673_vm8, %v837_v14, %v829_v54  ;;  %v3257_v54 = vld [vmem:[%s3671_s15] sm:$0xff] }
 0x1ff   : > { %v860_v37 = vmul.f32 %v844_v57, %v820_v4  ;;  %v861_v19 = vmul.f32 %v848_v12, %v821_v52 }
 0x201   : > { %v839_v20 = vpop.permute.xlu1 %838  ;;  %v831_v32 = vpop.permute.xlu0 %830  ;;  %v869_v34 = vadd.f32 %v861_v19, %v853_v23  ;;  %v868_v29 = vadd.f32 %v860_v37, %v852_v8 }
 0x202   : > { %v845_v61 = vsel %vm673_vm8, %v831_v32, %v839_v20  ;;  %v849_v33 = vsel %vm673_vm8, %v839_v20, %v831_v32  ;;  %v1313_v32 = vld [vmem:[#allocation7] ss:$8 sm:$0x7] }
 0x203   : > { %v862_v36 = vmul.f32 %v845_v61, %v822_v17  ;;  %v863_v39 = vmul.f32 %v849_v33, %v823_v55  ;;  %964 = vmatprep.mubr.f32.mxu0 %v869_v34  ;;  %1053 = vmatprep.mubr.f32.mxu1 %v869_v34  ;;  %v896_v17 = vmul.f32 %v3257_v54, %v3218_v60  ;;  %v3222_v55 = vpop.eup %3221 }
 0x204   : > { %965 = vmatmul.mubr.f32.vlgmr.msra.gmra.mrb[0].mxu0 %v868_v29  ;;  %1054 = vmatmul.mubr.f32.vlgmr.msra.gmra.mrb[0].mxu1 %v868_v29  ;;  %v3224_v57 = vpop.eup %3223  ;;  %v3998_v29 = vsub.s32 2, %v3657_v1  ;;  %v4001_v61 = vrot.slane %v1313_v32, %v3662_v2  ;;  %v4013_v1 = vrot.slane %v1355_v28, %v3665_v3 }
 0x205   : > { %2950 = vmatpush1.bf16.msra.mxu0 %v2949_v18  ;;  %v841_v25 = vpop.permute.xlu1 %840  ;;  %v833_v35 = vpop.permute.xlu0 %832  ;;  %2954 = vmatpush3.bf16.msra.mxu1 %v3859_v6  ;;  %v871_v38 = vadd.f32 %v863_v39, %v855_v43  ;;  %v870_v41 = vadd.f32 %v862_v36, %v854_v58  ;;  %v856_v6 = vmul.f32 %v795_v16, %v3902_v9  ;;  %v3260_v18 = vld [vmem:[%s3671_s15 + $0x30] sm:$0xff] }
 0x206   : > { %v846_v59 = vsel %vm673_vm8, %v833_v35, %v841_v25  ;;  %v850_v49 = vsel %vm673_vm8, %v841_v25, %v833_v35  ;;  %v858_v9 = vmul.f32 %v797_v46, %v3916_v26  ;;  %v897_v16 = vmul.f32 %v3258_v22, %v3220_v15  ;;  %v3259_v26 = vld [vmem:[%s3671_s15 + $0x20] sm:$0xff] }
 0x207   : > { %v864_v47 = vmul.f32 %v846_v59, %v824_v0  ;;  %v865_v50 = vmul.f32 %v850_v49, %v825_v56  ;;  %970 = vmatprep.mubr.f32.mxu0 %v871_v38  ;;  %1058 = vmatprep.mubr.f32.mxu1 %v871_v38  ;;  %v898_v12 = vmul.f32 %v3259_v26, %v3222_v55 }
 0x208   : > { %971 = vmatmul.mubr.f32.gmra.mrb[2].mxu0 %v870_v41  ;;  %1059 = vmatmul.mubr.f32.gmra.mrb[2].mxu1 %v870_v41  ;;  %v899_v7 = vmul.f32 %v3260_v18, %v3224_v57  ;;  %v4004_v43 = vrot.slane %v1313_v32, %v3665_v3  ;;  %v4007_v36 = vrot.slane %v1355_v28, %v3662_v2 }
 0x209   : > { %v843_v51 = vpop.permute.xlu1 %842  ;;  %v835_v30 = vpop.permute.xlu0 %834  ;;  %v873_v4 = vadd.f32 %v865_v50, %v857_v31  ;;  %v872_v52 = vadd.f32 %v864_v47, %v856_v6  ;;  %v1326_v40 = vrot.slane %v1313_v32, %v3998_v29  ;;  %v4033_v46 = vrot.slane %v1355_v28, %v3998_v29 }
 0x20a   : > { %v847_v5 = vsel %vm673_vm8, %v835_v30, %v843_v51  ;;  %v851_v63 = vsel %vm673_vm8, %v843_v51, %v835_v30 }
 0x20b   : > { %v866_v10 = vmul.f32 %v847_v5, %v826_v45  ;;  %v867_v11 = vmul.f32 %v851_v63, %v827_v62  ;;  %976 = vmatprep.mubr.f32.mxu0 %v873_v4  ;;  %1063 = vmatprep.mubr.f32.mxu1 %v873_v4 }
 0x20c   : > { %977 = vmatmul.mubr.f32.gmra.mrb[4].mxu0 %v872_v52  ;;  %1064 = vmatmul.mubr.f32.gmra.mrb[4].mxu1 %v872_v52 }
 0x20d   : > { %v875_v53 = vadd.f32 %v867_v11, %v859_v48  ;;  %v874_v14 = vadd.f32 %v866_v10, %v858_v9 }
 0x20f   : > { %982 = vmatprep.mubr.f32.mxu0 %v875_v53  ;;  %1068 = vmatprep.mubr.f32.mxu1 %v875_v53 }
 0x210   : > { %983 = vmatmul.mubr.f32.gmra.mrb[6].mxu0 %v874_v14  ;;  %1069 = vmatmul.mubr.f32.gmra.mrb[6].mxu1 %v874_v14 }
 0x211   : > { %1151 = vmatprep.mubr.f32.mxu0 %v4727_v21  ;;  %2745 = vmatprep.mubr.msk.f32.mxu1 %vm1074_vm9, %v896_v17 }
 0x214   : > { %2554 = vmatmul.mubr.msk.f32.vlgmr.msra.gmra.mrb[0].mxu0 %vm1074_vm9, %v896_v17  ;;  %2746 = vmatmul.mubr.msk.f32.vlgmr.msra.gmra.mrb[8].mxu1 %vm1074_vm9, %v897_v16 }
 0x215   : > { %1157 = vmatprep.mubr.f32.mxu0 %v4727_v21  ;;  %2748 = vmatprep.mubr.msk.f32.mxu1 %vm1074_vm9, %v898_v12 }
 0x218   : > { %2555 = vmatmul.mubr.msk.f32.gmra.mrb[2].mxu0 %vm1074_vm9, %v897_v16  ;;  %2749 = vmatmul.mubr.msk.f32.gmra.mrb[10].mxu1 %vm1074_vm9, %v899_v7 }
 0x219   : > { %1163 = vmatprep.mubr.f32.mxu0 %v4727_v21 }
 0x21c   : > { %2556 = vmatmul.mubr.msk.f32.gmra.mrb[4].mxu0 %vm1074_vm9, %v898_v12 }
 0x21d   : > { %1169 = vmatprep.mubr.f32.mxu0 %v4727_v21 }
 0x220   : > { %2557 = vmatmul.mubr.msk.f32.gmra.mrb[6].mxu0 %vm1074_vm9, %v899_v7 }
 0x2d7   : > { %v2625_v37 = vpop.f32.mrb[0].mxu1 }
 0x2d8   : > { %v2626_v19 = vpop.f32.mrb[1].mxu1 }
 0x2d9   : > { %v2627_v23 = vadd.f32 %v2626_v19, %v2625_v37  ;;  %v4132_v37 = vld [vmem:[#allocation7 + $0x2] ss:$8 sm:$0x7] }
 0x2db   : > { %v2628_v8 = vpop.f32.mrb[2].mxu1 }
 0x2dc   : > { %v2629_v13 = vpop.f32.mrb[3].mxu1 }
 0x2dd   : > { %v2630_v0 = vadd.f32 %v2629_v13, %v2628_v8 }
 0x2df   : > { %v2631_v56 = vpop.f32.mrb[4].mxu1 }
 0x2e0   : > { %v2632_v27 = vpop.f32.mrb[5].mxu1 }
 0x2e1   : > { %v2633_v20 = vadd.f32 %v2632_v27, %v2631_v56 }
 0x2e3   : > { %v2634_v34 = vpop.f32.mrb[6].mxu1 }
 0x2e4   : > { %v2635_v42 = vpop.f32.mrb[7].mxu1 }
 0x2e5   : > { %v2636_v33 = vadd.f32 %v2635_v42, %v2634_v34 }
 0x2e7   : > { %v4009_v39 = vpop.f32.mrb[0].mxu0  ;;  %v2747_v58 = vpop.f32.mrb[8].mxu1 }
 0x2e8   : > { %v4015_v24 = vadd.f32 %v2747_v58, %v2630_v0  ;;  %v4017_v25 = vpop.f32.mrb[1].mxu0  ;;  %v1242_v35 = vpop.f32.mrb[9].mxu1  ;;  %v4021_v38 = vsub.f32 %v4009_v39, %v4001_v61  ;;  %vm1372_vm11 = vcmp.lt.f32.partialorder %v4009_v39, %v4007_v36 }
 0x2e9   : > { %v4025_v41 = vsub.f32 %v4017_v25, %v4004_v43  ;;  %v4027_v45 = vadd.f32 %v2627_v23, %v1242_v35  ;;  %vm1373_vm13 = vcmp.lt.f32.partialorder %v4017_v25, %v4013_v1  ;;  %v4141_v23 = vrot.slane %v4132_v37, %v3998_v29 }
 0x2ea   : > { %4759 = vst [vmem:[#allocation13_spill] sm:$0xff] %v4015_v24  ;;  %vm1342_vm10 = vcmp.ge.f32.partialorder %v4021_v38, 0.0  ;;  %v4044_v31 = vsub.f32 %v4015_v24, %v1326_v40  ;;  %vm1377_vm8 = vcmp.lt.f32.partialorder %v4015_v24, %v4033_v46  ;;  %v1420_v12 = vmul.f32 2.4999995, %v4021_v38 }
 0x2eb   : > { %v4036_v59 = vsub.f32 %v4027_v45, %v1326_v40  ;;  %v4038_v49 = vpop.f32.mrb[2].mxu0  ;;  %v2750_v62 = vpop.f32.mrb[10].mxu1  ;;  %vm1343_vm12 = vcmp.ge.f32.partialorder %v4025_v41, 0.0  ;;  %vm1384_vm14 = vmand %vm1342_vm10, %vm1372_vm11  ;;  %vm1374_vm1 = vcmp.lt.f32.partialorder %v4027_v45, %v4033_v46  ;;  %v1452_v28 = vsub.f32 %v4141_v23, %v4027_v45 }
 0x2ec   : > { %4760 = vst [vmem:[#allocation14_spill] sm:$0xff] %v4038_v49  ;;  %4761 = vst [vmem:[#allocation15_spill] sm:$0xff] %v4044_v31  ;;  %v4046_v47 = vadd.f32 %v2750_v62, %v2636_v33  ;;  %v4048_v50 = vpop.f32.mrb[3].mxu0  ;;  %v1252_v6 = vpop.f32.mrb[11].mxu1  ;;  %v4051_v51 = vsel %vm1384_vm14, 1.0, %v4727_v21  ;;  %v4064_v60 = vsub.f32 %v4038_v49, %v4001_v61  ;;  %vm1375_vm3 = vcmp.lt.f32.partialorder %v4038_v49, %v4007_v36 }
 0x2ed   : > { %vm1385_vm15 = vmand %vm1343_vm12, %vm1373_vm13  ;;  %v4055_v30 = vsub.f32 %v4048_v50, %v4004_v43  ;;  %v4057_v4 = vadd.f32 %v2633_v20, %v1252_v6  ;;  %vm1344_vm0 = vcmp.ge.f32.partialorder %v4036_v59, 0.0  ;;  %vm1347_vm7 = vcmp.ge.f32.partialorder %v4044_v31, 0.0 }
 0x2ee   : > { %4762 = vst [vmem:[#allocation16_spill] sm:$0xff] %v4046_v47  ;;  %v4060_v52 = vsel %vm1385_vm15, 1.0, %v4727_v21  ;;  %4765 = vst [vmem:[#allocation19_spill] sm:$0xff] %v4064_v60  ;;  %vm1345_vm2 = vcmp.ge.f32.partialorder %v4064_v60, 0.0  ;;  %vm1376_vm10 = vcmp.lt.f32.partialorder %v4048_v50, %v4013_v1  ;;  %v4101_v14 = vsub.f32 %v4046_v47, %v1326_v40 }
 0x2ef   : > { %4763 = vst [vmem:[#allocation17_spill] sm:$0xff] %v4055_v30  ;;  %4764 = vst [vmem:[#allocation18_spill] sm:$0xff] %v4057_v4  ;;  %v3169_v5 = vpack.i.bf16 %v4060_v52, %v4051_v51  ;;  %v4071_v63 = vpop.f32.mrb[4].mxu0  ;;  %vm1346_vm5 = vcmp.ge.f32.partialorder %v4055_v30, 0.0  ;;  %v4078_v48 = vsub.f32 %v4057_v4, %v1326_v40  ;;  %v4153_v27 = vmul.f32 %v4051_v51, %v1420_v12 }
 0x2f0   : > { %4766 = vst [vmem:[#allocation20_spill] sm:$0xff] %v4071_v63  ;;  %vm1386_vm4 = vmand %vm1344_vm0, %vm1374_vm1  ;;  %v4081_v10 = vpop.f32.mrb[5].mxu0  ;;  %v4098_v53 = vsub.f32 %v4071_v63, %v4001_v61  ;;  %vm1378_vm15 = vcmp.lt.f32.partialorder %v4071_v63, %v4007_v36  ;;  %v1421_v20 = vmul.f32 2.4999995, %v4025_v41  ;;  %v1422_v34 = vmul.f32 2.4999995, %v4036_v59 }
 0x2f1   : > { %3170 = vrot.lane.b32.xlu0 %v3169_v5, %s3432_s26  ;;  %4767 = vst [vmem:[#allocation21_spill] sm:$0xff] %v4081_v10  ;;  %vm1387_vm6 = vmand %vm1345_vm2, %vm1375_vm3  ;;  %v2564_v11 = vsel %vm1386_vm4, 1.0, %v4727_v21  ;;  %v4089_v9 = vsub.f32 %v4081_v10, %v4004_v43  ;;  %vm1379_vm0 = vcmp.lt.f32.partialorder %v4081_v10, %v4013_v1  ;;  %vm1350_vm3 = vcmp.ge.f32.partialorder %v4078_v48, 0.0 }
 0x2f2   : > { %v4092_v15 = vsel %vm1387_vm6, 1.0, %v4727_v21  ;;  %vm1389_vm11 = vmand %vm1347_vm7, %vm1377_vm8  ;;  %vm1348_vm13 = vcmp.ge.f32.partialorder %v4098_v53, 0.0  ;;  %vm1380_vm4 = vcmp.lt.f32.partialorder %v4057_v4, %v4033_v46  ;;  %v1425_v33 = vmul.f32 2.4999995, %v4044_v31 }
 0x2f3   : > { %v3174_v54 = vpack.i.bf16 %v4092_v15, %v2564_v11  ;;  %vm1388_vm12 = vmand %vm1346_vm5, %vm1376_vm10  ;;  %v2567_v17 = vsel %vm1389_vm11, 1.0, %v4727_v21  ;;  %v4107_v55 = vpop.f32.mrb[6].mxu0  ;;  %vm1349_vm14 = vcmp.ge.f32.partialorder %v4089_v9, 0.0  ;;  %vm1353_vm11 = vcmp.ge.f32.partialorder %v4101_v14, 0.0 }
 0x2f4   : > { %4768 = vst [vmem:[#allocation22_spill] sm:$0xff] %v4107_v55  ;;  %v2566_v22 = vsel %vm1388_vm12, 1.0, %v4727_v21  ;;  %v4115_v57 = vpop.f32.mrb[7].mxu0  ;;  %vm1390_vm1 = vmand %vm1348_vm13, %vm1378_vm15  ;;  %v4121_v26 = vsub.f32 %v4107_v55, %v4001_v61  ;;  %vm1381_vm6 = vcmp.lt.f32.partialorder %v4107_v55, %v4007_v36  ;;  %vm1383_vm13 = vcmp.lt.f32.partialorder %v4046_v47, %v4033_v46 }
 0x2f5   : > { %3175 = vrot.lane.b32.xlu1 %v3174_v54, %s3432_s26  ;;  %v3179_v16 = vpack.i.bf16 %v2567_v17, %v2566_v22  ;;  %4769 = vst [vmem:[#allocation23_spill] sm:$0xff] %v4115_v57  ;;  %v4126_v18 = vsub.f32 %v4115_v57, %v4004_v43  ;;  %vm1391_vm2 = vmand %vm1349_vm14, %vm1379_vm0  ;;  %v2568_v7 = vsel %vm1390_vm1, 1.0, %v4727_v21  ;;  %vm1382_vm12 = vcmp.lt.f32.partialorder %v4115_v57, %v4013_v1 }
 0x2f6   : > { %v2569_v19 = vsel %vm1391_vm2, 1.0, %v4727_v21  ;;  %vm1351_vm5 = vcmp.ge.f32.partialorder %v4121_v26, 0.0  ;;  %vm1392_vm7 = vmand %vm1350_vm3, %vm1380_vm4  ;;  %v4163_v61 = vmul.f32 %v4060_v52, %v1421_v20  ;;  %v4166_v36 = vmul.f32 %v2564_v11, %v1422_v34 }
 0x2f7   : > { %3180 = vrot.lane.b32.xlu0 %v3179_v16, %s3432_s26  ;;  %v3184_v8 = vpack.i.bf16 %v2569_v19, %v2568_v7  ;;  %vm1393_vm8 = vmand %vm1351_vm5, %vm1381_vm6  ;;  %vm1352_vm10 = vcmp.ge.f32.partialorder %v4126_v18, 0.0  ;;  %v2570_v13 = vsel %vm1392_vm7, 1.0, %v4727_v21  ;;  %v1455_v58 = vsub.f32 %v4141_v23, %v4015_v24 }
 0x2f8   : > { %v2571_v0 = vsel %vm1393_vm8, 1.0, %v4727_v21  ;;  %vm1394_vm14 = vmand %vm1352_vm10, %vm1382_vm12  ;;  %v4170_v40 = vmul.f32 %v2567_v17, %v1425_v33  ;;  %v1424_v1 = vmul.f32 2.4999995, %v4055_v30  ;;  %v1423_v35 = vmul.f32 2.4999995, %v4064_v60 }
 0x2f9   : > { %3185 = vrot.lane.b32.xlu1 %v3184_v8, %s3432_s26  ;;  %v3189_v56 = vpack.i.bf16 %v2571_v0, %v2570_v13  ;;  %vm1395_vm15 = vmand %vm1353_vm11, %vm1383_vm13  ;;  %v2572_v32 = vsel %vm1394_vm14, 1.0, %v4727_v21  ;;  %v1428_v46 = vmul.f32 2.4999995, %v4078_v48  ;;  %v1458_v6 = vsub.f32 %v4141_v23, %v4057_v4  ;;  %v4189_v17 = vld [vmem:[#allocation7 + $0x3] ss:$8 sm:$0x7] }
 0x2fa   : > { %v2573_v42 = vsel %vm1395_vm15, 1.0, %v4727_v21  ;;  %v4176_v62 = vmul.f32 %v2566_v22, %v1424_v1  ;;  %v1427_v51 = vmul.f32 2.4999995, %v4089_v9  ;;  %v4182_v52 = vmul.f32 %v4092_v15, %v1423_v35 }
 0x2fb   : > { %3190 = vrot.lane.b32.xlu0 %v3189_v56, %s3432_s26  ;;  %v3194_v43 = vpack.i.bf16 %v2573_v42, %v2572_v32  ;;  %v4184_v5 = vmul.f32 %v2570_v13, %v1428_v46  ;;  %v1426_v54 = vmul.f32 2.4999995, %v4098_v53  ;;  %v1429_v16 = vmul.f32 2.4999995, %v4121_v26 }
 0x2fc   : > { %v4186_v11 = vmul.f32 %v2569_v19, %v1427_v51  ;;  %v1430_v22 = vmul.f32 2.4999995, %v4126_v18  ;;  %v4195_v12 = vrot.slane %v4189_v17, %v3998_v29  ;;  %v1431_v15 = vmul.f32 2.4999995, %v4101_v14 }
 0x2fd   : > { %3195 = vrot.lane.b32.xlu1 %v3194_v43, %s3432_s26  ;;  %v4197_v8 = vmul.f32 %v2568_v7, %v1426_v54  ;;  %v4200_v13 = vmul.f32 %v2571_v0, %v1429_v16  ;;  %v1461_v56 = vsub.f32 %v4141_v23, %v4046_v47  ;;  %v4214_v43 = vld [vmem:[#allocation7 + $0x4] ss:$8 sm:$0x7]  ;;  %v1438_v46 = vrot.slane %v4132_v37, %v3662_v2 }
 0x2fe   : > { %v4202_v19 = vmul.f32 %v2572_v32, %v1430_v22  ;;  %v4206_v20 = vmul.f32 %v2573_v42, %v1431_v15  ;;  %4770 = vst [vmem:[#allocation24_spill] sm:$0xff] %v4214_v43  ;;  %v4218_v0 = vrot.slane %v4214_v43, %v3998_v29  ;;  %v1442_v29 = vrot.slane %v4132_v37, %v3665_v3 }
 0x2ff   : > { %v1450_v51 = vsub.f32 %v1438_v46, %v4009_v39  ;;  %v1453_v22 = vsub.f32 %v1438_v46, %v4038_v49  ;;  %v1456_v21 = vsub.f32 %v1438_v46, %v4071_v63  ;;  %vm1498_vm0 = vcmp.lt.s32.totalorder %v3766_v44, 96 }
 0x300   : > { %4771 = vst [vmem:[#allocation25_spill] sm:$0xff] %v4218_v0  ;;  %v1451_v54 = vsub.f32 %v1442_v29, %v4017_v25  ;;  %v1454_v16 = vsub.f32 %v1442_v29, %v4048_v50  ;;  %v1457_v15 = vsub.f32 %v1442_v29, %v4081_v10  ;;  %v1459_v42 = vsub.f32 %v1438_v46, %v4107_v55 }
 0x301   : > { %v1462_v1 = vmul.f32 2.4999995, %v1450_v51  ;;  %v1460_v37 = vsub.f32 %v1442_v29, %v4115_v57  ;;  %v1464_v33 = vmul.f32 2.4999995, %v1452_v28  ;;  %v1467_v34 = vmul.f32 2.4999995, %v1455_v58 }
 0x302   : > { %v1463_v7 = vmul.f32 2.4999995, %v1451_v54  ;;  %v1466_v0 = vmul.f32 2.4999995, %v1454_v16  ;;  %v1465_v43 = vmul.f32 2.4999995, %v1453_v22 }
 0x303   : > { %v1470_v4 = vmul.f32 2.4999995, %v1458_v6  ;;  %v1469_v24 = vmul.f32 2.4999995, %v1457_v15  ;;  %v1468_v63 = vmul.f32 2.4999995, %v1456_v21 }
 0x304   : > { %v4245_v51 = vmul.f32 2.4999995, %v1459_v42  ;;  %v4247_v46 = vmul.f32 2.4999995, %v1460_v37  ;;  %v1549_v29 = vmul.f32 1.2499998, %v4036_v59 }
 0x305   : > { %v1473_v28 = vmul.f32 2.4999995, %v1461_v56  ;;  %v1548_v58 = vmul.f32 1.2499998, %v4025_v41  ;;  %v1547_v6 = vmul.f32 1.2499998, %v4021_v38 }
 0x306   : > { %v1550_v21 = vmul.f32 1.2499998, %v4064_v60  ;;  %vm1993_vm1 = vcmask 261120   ;;  %vm2415_vm15 = vcmask 64512  }
 0x363   : > { %v3171_v35 = vpop.permute.xlu0 %3170 }
 0x364   : > { %v3173_v32 = vunpack.i.h.bf16 %v3171_v35  ;;  %v3172_v23 = vunpack.i.l.bf16 %v3171_v35 }
 0x366   : > { %v1503_v47 = vsel %vm1498_vm0, %v3172_v23, %v3173_v32 }
 0x367   : > { %v3176_v10 = vpop.permute.xlu1 %3175  ;;  %v1523_v49 = vmul.f32 %v1503_v47, %v1462_v1  ;;  %v1552_v47 = vmul.f32 1.2499998, %v4044_v31 }
 0x368   : > { %v3178_v35 = vunpack.i.h.bf16 %v3176_v10  ;;  %v3177_v54 = vunpack.i.l.bf16 %v3176_v10 }
 0x369   : > { %v3181_v16 = vpop.permute.xlu0 %3180  ;;  %v1535_v22 = vadd.f32 %v1523_v49, %v4153_v27  ;;  %v1551_v49 = vmul.f32 1.2499998, %v4055_v30  ;;  %v1555_v30 = vmul.f32 1.2499998, %v4078_v48 }
 0x36a   : > { %v1499_v42 = vsel %vm1498_vm0, %v3173_v32, %v3177_v54  ;;  %v1507_v1 = vsel %vm1498_vm0, %v3177_v54, %v3172_v23  ;;  %v3183_v15 = vunpack.i.h.bf16 %v3181_v16  ;;  %v3182_v10 = vunpack.i.l.bf16 %v3181_v16 }
 0x36b   : > { %1601 = vrot.lane.b32.xlu0 %v1535_v22, %s3432_s26  ;;  %v1524_v56 = vmul.f32 %v1499_v42, %v1463_v7  ;;  %v1525_v37 = vmul.f32 %v1507_v1, %v1464_v33  ;;  %v4260_v57 = vmul.f32 %v1547_v6, %v1535_v22  ;;  %v3186_v23 = vpop.permute.xlu1 %3185  ;;  %v1553_v54 = vmul.f32 1.2499998, %v4098_v53 }
 0x36c   : > { %v1508_v27 = vsel %vm1498_vm0, %v3183_v15, %v3178_v35  ;;  %v1500_v60 = vsel %vm1498_vm0, %v3182_v10, %v3183_v15  ;;  %v1504_v32 = vsel %vm1498_vm0, %v3178_v35, %v3182_v10  ;;  %v3188_v16 = vunpack.i.h.bf16 %v3186_v23 }
 0x36d   : > { %v3187_v31 = vunpack.i.l.bf16 %v3186_v23  ;;  %v1536_v33 = vadd.f32 %v1524_v56, %v4163_v61  ;;  %v1537_v7 = vadd.f32 %v1525_v37, %v4166_v36  ;;  %v3191_v22 = vpop.permute.xlu0 %3190  ;;  %v1528_v6 = vmul.f32 %v1508_v27, %v1467_v34 }
 0x36e   : > { %v1527_v42 = vmul.f32 %v1500_v60, %v1466_v0  ;;  %v1526_v1 = vmul.f32 %v1504_v32, %v1465_v43  ;;  %v3193_v55 = vunpack.i.h.bf16 %v3191_v22  ;;  %v3192_v35 = vunpack.i.l.bf16 %v3191_v22 }
 0x36f   : > { %v1505_v15 = vsel %vm1498_vm0, %v3187_v31, %v3188_v16  ;;  %1609 = vrot.lane.b32.xlu1 %v1536_v33, %s3432_s26  ;;  %1617 = vrot.lane.b32.xlu0 %v1537_v7, %s3432_s26  ;;  %v4277_v10 = vmul.f32 %v1549_v29, %v1537_v7  ;;  %v1540_v61 = vadd.f32 %v1528_v6, %v4170_v40  ;;  %v3196_v56 = vpop.permute.xlu1 %3195  ;;  %v1556_v27 = vmul.f32 1.2499998, %v4121_v26 }
 0x370   : > { %v1539_v36 = vadd.f32 %v1527_v42, %v4176_v62  ;;  %v1538_v60 = vadd.f32 %v1526_v1, %v4182_v52  ;;  %v1529_v34 = vmul.f32 %v1505_v15, %v1468_v63  ;;  %v1501_v43 = vsel %vm1498_vm0, %v3188_v16, %v3192_v35  ;;  %v1266_v1 = vld [vmem:[#allocation9 + $0x8] sm:$0xff]  ;;  %v1283_v15 = vld [vmem:[#allocation9 + $0x90] sm:$0xff] }
 0x371   : > { %v1509_v0 = vsel %vm1498_vm0, %v3192_v35, %v3187_v31  ;;  %v4286_v37 = vmul.f32 %v1548_v58, %v1536_v33  ;;  %v3198_v29 = vunpack.i.h.bf16 %v3196_v56  ;;  %v3197_v32 = vunpack.i.l.bf16 %v3196_v56  ;;  %v1284_v35 = vld [vmem:[#allocation9 + $0x98] sm:$0xff] }
 0x372   : > { %v1531_v23 = vmul.f32 %v1509_v0, %v1470_v4  ;;  %v1530_v40 = vmul.f32 %v1501_v43, %v1469_v24  ;;  %v1541_v63 = vadd.f32 %v1529_v34, %v4197_v8  ;;  %v4292_v62 = vmul.f32 %v1550_v21, %v1538_v60  ;;  %v1298_v34 = vld [vmem:[#allocation9 + $0x108] sm:$0xff]  ;;  %v1267_v43 = vld [vmem:[#allocation9 + $0x10] sm:$0xff]  ;;  %v1268_v56 = vld [vmem:[#allocation9 + $0x18] sm:$0xff] }
 0x373   : > { %1619 = vrot.lane.b32.xlu1 %v1540_v61, %s3432_s26  ;;  %1611 = vrot.lane.b32.xlu0 %v1539_v36, %s3432_s26  ;;  %v4294_v52 = vmul.f32 %v1552_v47, %v1540_v61  ;;  %v1558_v31 = vmul.f32 1.2499998, %v4101_v14  ;;  %v1510_v58 = vsel %vm1498_vm0, %v3198_v29, %v3193_v55  ;;  %v1502_v16 = vsel %vm1498_vm0, %v3197_v32, %v3198_v29  ;;  %v1286_v29 = vld [vmem:[#allocation9 + $0xa8] sm:$0xff] }
 0x374   : > { %v1506_v24 = vsel %vm1498_vm0, %v3193_v55, %v3197_v32  ;;  %v1543_v4 = vadd.f32 %v1531_v23, %v4184_v5  ;;  %v1542_v33 = vadd.f32 %v1530_v40, %v4186_v11  ;;  %v1533_v21 = vmul.f32 %v1502_v16, %v4247_v46  ;;  %v1299_v23 = vld [vmem:[#allocation9 + $0x110] sm:$0xff]  ;;  %v1300_v40 = vld [vmem:[#allocation9 + $0x118] sm:$0xff]  ;;  %v1270_v16 = vld [vmem:[#allocation9 + $0x28] sm:$0xff] }
 0x375   : > { %v1532_v8 = vmul.f32 %v1506_v24, %v4245_v51  ;;  %v1534_v47 = vmul.f32 %v1510_v58, %v1473_v28  ;;  %v4307_v7 = vmul.f32 %v1551_v49, %v1539_v36  ;;  %v4309_v22 = vmul.f32 %v1553_v54, %v1541_v63  ;;  %v1269_v58 = vld [vmem:[#allocation9 + $0x20] sm:$0xff]  ;;  %v1287_v24 = vld [vmem:[#allocation9 + $0xb0] sm:$0xff] }
 0x376   : > { %v4311_v6 = vmul.f32 %v1555_v30, %v1543_v4  ;;  %v1554_v42 = vmul.f32 1.2499998, %v4089_v9  ;;  %v1545_v5 = vadd.f32 %v1533_v21, %v4202_v19  ;;  %v1557_v51 = vmul.f32 1.2499998, %v4126_v18  ;;  %v1282_v19 = vld [vmem:[#allocation9 + $0x88] sm:$0xff] }
 0x377   : > { %1603 = vrot.lane.b32.xlu1 %v1538_v60, %s3432_s26  ;;  %1621 = vrot.lane.b32.xlu0 %v1543_v4, %s3432_s26  ;;  %v1544_v55 = vadd.f32 %v1532_v8, %v4200_v13  ;;  %v1546_v11 = vadd.f32 %v1534_v47, %v4206_v20  ;;  %v1281_v13 = vld [vmem:[#allocation9 + $0x80] sm:$0xff]  ;;  %v2959_v36 = vpack.c.bf16 %v1284_v35, %v1283_v15  ;;  %v1288_v4 = vld [vmem:[#allocation9 + $0xb8] sm:$0xff]  ;;  %v1302_v8 = vld [vmem:[#allocation9 + $0x128] sm:$0xff] }
 0x378   : > { %v4320_v46 = vmul.f32 %v1554_v42, %v1542_v33  ;;  %v4326_v49 = vmul.f32 %v1557_v51, %v1545_v5  ;;  %v1265_v20 = vld [vmem:[#allocation9] sm:$0xff]  ;;  %v2955_v54 = vpack.c.bf16 %v1282_v19, %v1281_v13  ;;  %v2961_v32 = vpack.c.bf16 %v1268_v56, %v1267_v43  ;;  %v1303_v42 = vld [vmem:[#allocation9 + $0x130] sm:$0xff]  ;;  %v1272_v51 = vld [vmem:[#allocation9 + $0x38] sm:$0xff] }
 0x379   : > { %v4322_v28 = vmul.f32 %v1556_v27, %v1544_v55  ;;  %v4324_v30 = vmul.f32 %v1558_v31, %v1546_v11  ;;  %v2957_v61 = vpack.c.bf16 %v1266_v1, %v1265_v20  ;;  %v1297_v60 = vld [vmem:[#allocation9 + $0x100] sm:$0xff]  ;;  %v2991_v31 = vpack.c.bf16 %v1300_v40, %v1299_v23  ;;  %v1290_v19 = vld [vmem:[#allocation9 + $0xc8] sm:$0xff] }
 0x37a   : > { %2956 = vmatprep.subr.bf16.mxu1 %v2955_v54  ;;  %v2987_v0 = vpack.c.bf16 %v1298_v34, %v1297_v60  ;;  %v1285_v27 = vld [vmem:[#allocation9 + $0xa0] sm:$0xff]  ;;  %v2965_v47 = vpack.c.bf16 %v1270_v16, %v1269_v58  ;;  %v1306_v15 = vld [vmem:[#allocation9 + $0x148] sm:$0xff]  ;;  %v1291_v60 = vld [vmem:[#allocation9 + $0xd0] sm:$0xff]  ;;  %v4335_v23 = vrot.slane %v4189_v17, %v3662_v2  ;;  %v4339_v40 = vrot.slane %v4189_v17, %v3665_v3 }
 0x37b   : > { %1613 = vrot.lane.b32.xlu1 %v1542_v33, %s3432_s26  ;;  %1605 = vrot.lane.b32.xlu0 %v1541_v63, %s3432_s26  ;;  %v2963_v63 = vpack.c.bf16 %v1286_v29, %v1285_v27  ;;  %v1301_v33 = vld [vmem:[#allocation9 + $0x120] sm:$0xff]  ;;  %v1292_v34 = vld [vmem:[#allocation9 + $0xd8] sm:$0xff]  ;;  %v1275_v27 = vld [vmem:[#allocation9 + $0x50] sm:$0xff] }
 0x37c   : > { %2958 = vmatpush3.bf16.msra.mxu1 %v2957_v61  ;;  %2988 = vmatprep.subr.bf16.mxu0 %v2987_v0  ;;  %v2995_v21 = vpack.c.bf16 %v1302_v8, %v1301_v33  ;;  %v1289_v13 = vld [vmem:[#allocation9 + $0xc0] sm:$0xff]  ;;  %v2975_v56 = vpack.c.bf16 %v1292_v34, %v1291_v60  ;;  %v1276_v29 = vld [vmem:[#allocation9 + $0x58] sm:$0xff]  ;;  %v1307_v58 = vld [vmem:[#allocation9 + $0x150] sm:$0xff]  ;;  %v1577_v16 = vsub.f32 %v4335_v23, %v4009_v39 }
 0x37d   : > { %2960 = vmatprep.subr.bf16.mxu1 %v2959_v36  ;;  %2990 = vmatpush3.bf16.msra.mxu0 %v2987_v0  ;;  %v1305_v1 = vld [vmem:[#allocation9 + $0x140] sm:$0xff]  ;;  %v2971_v35 = vpack.c.bf16 %v1290_v19, %v1289_v13  ;;  %v1274_v36 = vld [vmem:[#allocation9 + $0x48] sm:$0xff]  ;;  %v1308_v33 = vld [vmem:[#allocation9 + $0x158] sm:$0xff]  ;;  %v4772_v13 = vsub.f32 %v4195_v12, %v4027_v45 }
 0x37e   : > { %2992 = vmatprep.subr.bf16.mxu0 %v2991_v31  ;;  %v1273_v61 = vld [vmem:[#allocation9 + $0x40] sm:$0xff]  ;;  %v3003_v43 = vpack.c.bf16 %v1306_v15, %v1305_v1  ;;  %v1589_v17 = vmul.f32 1.2499998, %v1577_v16  ;;  %v1295_v15 = vld [vmem:[#allocation9 + $0xf0] sm:$0xff]  ;;  %v1673_v16 = vmul.f32 0.83333313, %v4021_v38 }
 0x37f   : > { %1607 = vrot.lane.b32.xlu1 %v1544_v55, %s3432_s26  ;;  %1615 = vrot.lane.b32.xlu0 %v1545_v5, %s3432_s26  ;;  %v1304_v55 = vld [vmem:[#allocation9 + $0x138] sm:$0xff]  ;;  %v2967_v5 = vpack.c.bf16 %v1288_v4, %v1287_v24  ;;  %v2973_v0 = vpack.c.bf16 %v1274_v36, %v1273_v61  ;;  %v1578_v24 = vsub.f32 %v4339_v40, %v4017_v25  ;;  %v1277_v8 = vld [vmem:[#allocation9 + $0x60] sm:$0xff]  ;;  %v1591_v19 = vmul.f32 1.2499998, %v4772_v13 }
 0x380   : > { %2962 = vmatpush3.bf16.msra.mxu1 %v2961_v32  ;;  %v2999_v20 = vpack.c.bf16 %v1304_v55, %v1303_v42  ;;  %v2977_v32 = vpack.c.bf16 %v1276_v29, %v1275_v27  ;;  %v3007_v42 = vpack.c.bf16 %v1308_v33, %v1307_v58  ;;  %v1309_v61 = vld [vmem:[#allocation9 + $0x160] sm:$0xff]  ;;  %v1280_v27 = vld [vmem:[#allocation9 + $0x78] sm:$0xff] }
 0x381   : > { %2964 = vmatprep.subr.bf16.mxu1 %v2963_v63  ;;  %2994 = vmatpush3.bf16.msra.mxu0 %v2991_v31  ;;  %v1293_v63 = vld [vmem:[#allocation9 + $0xe0] sm:$0xff]  ;;  %v1294_v31 = vld [vmem:[#allocation9 + $0xe8] sm:$0xff]  ;;  %v1312_v38 = vld [vmem:[#allocation9 + $0x178] sm:$0xff] }
 0x382   : > { %2996 = vmatprep.subr.bf16.mxu0 %v2995_v21  ;;  %v2979_v4 = vpack.c.bf16 %v1294_v31, %v1293_v63  ;;  %v4775_v13 = vld [vmem:[#allocation20_spill] sm:$0xff] }
 0x383   : > { %1623 = vrot.lane.b32.xlu1 %v1546_v11, %s3432_s26  ;;  %v1271_v11 = vld [vmem:[#allocation9 + $0x30] sm:$0xff] }
 0x384   : > { %2966 = vmatpush3.bf16.msra.mxu1 %v2965_v47  ;;  %v2969_v54 = vpack.c.bf16 %v1272_v51, %v1271_v11  ;;  %v1581_v11 = vsub.f32 %v4339_v40, %v4048_v50 }
 0x385   : > { %2968 = vmatprep.subr.bf16.mxu1 %v2967_v5  ;;  %2998 = vmatpush3.bf16.msra.mxu0 %v2995_v21  ;;  %v1278_v21 = vld [vmem:[#allocation9 + $0x68] sm:$0xff]  ;;  %v1590_v5 = vmul.f32 1.2499998, %v1578_v24 }
 0x386   : > { %3000 = vmatprep.subr.bf16.mxu0 %v2999_v20  ;;  %v2981_v55 = vpack.c.bf16 %v1278_v21, %v1277_v8  ;;  %v1593_v58 = vmul.f32 1.2499998, %v1581_v11 }
 0x388   : > { %2970 = vmatpush3.bf16.msra.mxu1 %v2969_v54  ;;  %v4773_v54 = vld [vmem:[#allocation14_spill] sm:$0xff] }
 0x389   : > { %2972 = vmatprep.subr.bf16.mxu1 %v2971_v35  ;;  %3002 = vmatpush3.bf16.msra.mxu0 %v2999_v20  ;;  %v1580_v1 = vsub.f32 %v4335_v23, %v4773_v54  ;;  %v1296_v35 = vld [vmem:[#allocation9 + $0xf8] sm:$0xff] }
 0x38a   : > { %3004 = vmatprep.subr.bf16.mxu0 %v3003_v43 }
 0x38c   : > { %2974 = vmatpush3.bf16.msra.mxu1 %v2973_v0  ;;  %v1310_v0 = vld [vmem:[#allocation9 + $0x168] sm:$0xff] }
 0x38d   : > { %2976 = vmatprep.subr.bf16.mxu1 %v2975_v56  ;;  %3006 = vmatpush3.bf16.msra.mxu0 %v3003_v43  ;;  %v2983_v43 = vpack.c.bf16 %v1296_v35, %v1295_v15  ;;  %v1279_v56 = vld [vmem:[#allocation9 + $0x70] sm:$0xff]  ;;  %v3011_v31 = vpack.c.bf16 %v1310_v0, %v1309_v61  ;;  %v4779_v0 = vld [vmem:[#allocation17_spill] sm:$0xff] }
 0x38e   : > { %3008 = vmatprep.subr.bf16.mxu0 %v3007_v42  ;;  %v2985_v24 = vpack.c.bf16 %v1280_v27, %v1279_v56  ;;  %v1677_v56 = vmul.f32 0.83333313, %v4779_v0  ;;  %v1680_v0 = vmul.f32 0.83333313, %v4089_v9 }
 0x390   : > { %2978 = vmatpush3.bf16.msra.mxu1 %v2977_v32 }
 0x391   : > { %2980 = vmatprep.subr.bf16.mxu1 %v2979_v4  ;;  %3010 = vmatpush3.bf16.msra.mxu0 %v3007_v42  ;;  %v1674_v42 = vmul.f32 0.83333313, %v4025_v41  ;;  %v4774_v41 = vld [vmem:[#allocation21_spill] sm:$0xff] }
 0x392   : > { %3012 = vmatprep.subr.bf16.mxu0 %v3011_v31 }
 0x394   : > { %2982 = vmatpush3.bf16.msra.mxu1 %v2981_v55 }
 0x395   : > { %2984 = vmatprep.subr.bf16.mxu1 %v2983_v43  ;;  %3014 = vmatpush3.bf16.msra.mxu0 %v3011_v31  ;;  %v4780_v31 = vld [vmem:[#allocation15_spill] sm:$0xff] }
 0x398   : > { %2986 = vmatpush3.bf16.msra.mxu1 %v2985_v24  ;;  %v4781_v24 = vld [vmem:[#allocation18_spill] sm:$0xff] }
 0x3dd   : > { %v1602_v47 = vpop.permute.xlu0 %1601 }
 0x3e1   : > { %v1610_v51 = vpop.permute.xlu1 %1609  ;;  %v1618_v20 = vpop.permute.xlu0 %1617 }
 0x3e2   : > { %v1629_v36 = vsel %vm1498_vm0, %v1602_v47, %v1610_v51  ;;  %v1625_v60 = vsel %vm1498_vm0, %v1610_v51, %v1618_v20  ;;  %v1633_v34 = vsel %vm1498_vm0, %v1618_v20, %v1602_v47  ;;  %v1584_v51 = vsub.f32 %v4339_v40, %v4774_v41 }
 0x3e3   : > { %v1649_v29 = vmul.f32 %v1629_v36, %v1589_v17  ;;  %v1650_v32 = vmul.f32 %v1625_v60, %v1590_v5  ;;  %v1651_v63 = vmul.f32 %v1633_v34, %v1591_v19  ;;  %v1311_v17 = vld [vmem:[#allocation9 + $0x170] sm:$0xff]  ;;  %v1675_v5 = vmul.f32 0.83333313, %v4036_v59  ;;  %v4776_v59 = vld [vmem:[#allocation13_spill] sm:$0xff] }
 0x3e4   : > { %v1583_v19 = vsub.f32 %v4335_v23, %v4775_v13  ;;  %v3015_v20 = vpack.c.bf16 %v1312_v38, %v1311_v17  ;;  %v4777_v35 = vsub.f32 %v4195_v12, %v4776_v59  ;;  %v4783_v38 = vld [vmem:[#allocation23_spill] sm:$0xff] }
 0x3e5   : > { %v1620_v4 = vpop.permute.xlu1 %1619  ;;  %v1612_v33 = vpop.permute.xlu0 %1611  ;;  %v1663_v8 = vadd.f32 %v1651_v63, %v4277_v10  ;;  %v1662_v21 = vadd.f32 %v1650_v32, %v4286_v37  ;;  %v1661_v47 = vadd.f32 %v1649_v29, %v4260_v57  ;;  %v1592_v10 = vmul.f32 1.2499998, %v1580_v1  ;;  %v4778_v1 = vld [vmem:[#allocation22_spill] sm:$0xff] }
 0x3e6   : > { %v1626_v55 = vsel %vm1498_vm0, %v1612_v33, %v1620_v4  ;;  %v1594_v61 = vmul.f32 1.2499998, %v4777_v35  ;;  %v1586_v34 = vsub.f32 %v4335_v23, %v4778_v1  ;;  %3016 = vmatprep.subr.bf16.mxu0 %v3015_v20  ;;  %v1596_v23 = vmul.f32 1.2499998, %v1584_v51  ;;  %v4784_v51 = vld [vmem:[#allocation19_spill] sm:$0xff] }
 0x3e7   : > { %v1653_v11 = vmul.f32 %v1626_v55, %v1593_v58  ;;  %1743 = vrot.lane.b32.xlu1 %v1663_v8, %s3432_s26  ;;  %1735 = vrot.lane.b32.xlu0 %v1662_v21, %s3432_s26  ;;  %v4368_v37 = vmul.f32 %v1673_v16, %v1661_v47  ;;  %v4370_v57 = vmul.f32 %v1674_v42, %v1662_v21  ;;  %v1678_v58 = vmul.f32 0.83333313, %v4780_v31 }
 0x3e8   : > { %v4376_v15 = vmul.f32 %v1675_v5, %v1663_v8  ;;  %3018 = vmatpush3.bf16.msra.mxu0 %v3015_v20  ;;  %v4782_v8 = vsub.f32 %v4195_v12, %v4781_v24  ;;  %v1598_v17 = vmul.f32 1.2499998, %v1586_v34  ;;  %v1681_v34 = vmul.f32 0.83333313, %v4078_v48 }
 0x3e9   : > { %v1604_v36 = vpop.permute.xlu1 %1603  ;;  %v1622_v60 = vpop.permute.xlu0 %1621  ;;  %v1665_v43 = vadd.f32 %v1653_v11, %v4307_v7  ;;  %v1595_v7 = vmul.f32 1.2499998, %v1583_v19  ;;  %v1676_v19 = vmul.f32 0.83333313, %v4784_v51  ;;  %v1679_v31 = vmul.f32 0.83333313, %v4098_v53 }
 0x3ea   : > { %v1630_v27 = vsel %vm1498_vm0, %v1604_v36, %v1612_v33  ;;  %v1634_v29 = vsel %vm1498_vm0, %v1620_v4, %v1604_v36  ;;  %v1597_v21 = vmul.f32 1.2499998, %v4782_v8 }
 0x3eb   : > { %v1652_v32 = vmul.f32 %v1630_v27, %v1592_v10  ;;  %v1654_v63 = vmul.f32 %v1634_v29, %v1594_v61  ;;  %1727 = vrot.lane.b32.xlu0 %v1661_v47, %s3432_s26  ;;  %v4391_v16 = vmul.f32 %v1677_v56, %v1665_v43  ;;  %v1587_v47 = vsub.f32 %v4339_v40, %v4783_v38  ;;  %v1261_v40 = vld [vmem:[%s4717_s5] sm:$0xff]  ;;  %v1262_v61 = vld [vmem:[%s4717_s5 + $0x8] sm:$0xff] }
 0x3ed   : > { %v1614_v33 = vpop.permute.xlu1 %1613  ;;  %v1606_v42 = vpop.permute.xlu0 %1605  ;;  %v1664_v4 = vadd.f32 %v1652_v32, %v4292_v62  ;;  %v1666_v55 = vadd.f32 %v1654_v63, %v4294_v52 }
 0x3ee   : > { %v1627_v5 = vsel %vm1498_vm0, %v1614_v33, %v1622_v60  ;;  %v1631_v11 = vsel %vm1498_vm0, %v1606_v42, %v1614_v33  ;;  %v1635_v10 = vsel %vm1498_vm0, %v1622_v60, %v1606_v42  ;;  %v4419_v60 = vpack.c.bf16 %v1262_v61, %v1261_v40 }
 0x3ef   : > { %v1656_v20 = vmul.f32 %v1627_v5, %v1596_v23  ;;  %v1655_v35 = vmul.f32 %v1631_v11, %v1595_v7  ;;  %v1657_v62 = vmul.f32 %v1635_v10, %v1597_v21  ;;  %1729 = vrot.lane.b32.xlu1 %v1664_v4, %s3432_s26  ;;  %v4408_v52 = vmul.f32 %v1678_v58, %v1666_v55 }
 0x3f0   : > { %1745 = vrot.lane.b32.xlu0 %v1666_v55, %s3432_s26  ;;  %v4417_v36 = vmul.f32 %v1676_v19, %v1664_v4  ;;  %3020 = vmatprep.subr.bf16.mxu0 %v4419_v60  ;;  %v1682_v33 = vmul.f32 0.83333313, %v4121_v26  ;;  %v1684_v26 = vmul.f32 0.83333313, %v4101_v14  ;;  %v1799_v10 = vsub.f32 0.0, %v4009_v39  ;;  %v4787_v14 = vld [vmem:[#allocation24_spill] sm:$0xff] }
 0x3f1   : > { %v1608_v56 = vpop.permute.xlu1 %1607  ;;  %v1616_v27 = vpop.permute.xlu0 %1615  ;;  %v1667_v29 = vadd.f32 %v1655_v35, %v4309_v22  ;;  %v1669_v32 = vadd.f32 %v1657_v62, %v4311_v6  ;;  %v1668_v63 = vadd.f32 %v1656_v20, %v4320_v46  ;;  %v1599_v22 = vmul.f32 1.2499998, %v1587_v47  ;;  %v4785_v6 = vld [vmem:[#allocation16_spill] sm:$0xff] }
 0x3f2   : > { %v1632_v58 = vsel %vm1498_vm0, %v1608_v56, %v1616_v27  ;;  %v4786_v53 = vsub.f32 %v4195_v12, %v4785_v6  ;;  %v1683_v47 = vmul.f32 0.83333313, %v4126_v18  ;;  %v1803_v51 = vmul.f32 1.442695, %v1799_v10 }
 0x3f3   : > { %v1658_v23 = vmul.f32 %v1632_v58, %v1598_v17  ;;  %1737 = vrot.lane.b32.xlu1 %v1665_v43, %s3432_s26  ;;  %v4431_v48 = vmul.f32 %v1681_v34, %v1669_v32  ;;  %v4433_v9 = vmul.f32 %v1680_v0, %v1668_v63  ;;  %v4435_v7 = vmul.f32 %v1679_v31, %v1667_v29 }
 0x3f4   : > { %1731 = vrot.lane.b32.xlu0 %v1667_v29, %s3432_s26  ;;  %v1600_v46 = vmul.f32 1.2499998, %v4786_v53  ;;  %v4467_v18 = vrot.slane %v4787_v14, %v3665_v3  ;;  %3225 = vpow2.f32 %v1803_v51  ;;  %v1802_v20 = vsub.f32 0.0, %v4778_v1 }
 0x3f5   : > { %v1624_v8 = vpop.permute.xlu1 %1623  ;;  %v1670_v21 = vadd.f32 %v1658_v23, %v4322_v28  ;;  %v4474_v40 = vrot.slane %v4787_v14, %v3662_v2 }
 0x3f6   : > { %v1628_v43 = vsel %vm1498_vm0, %v1616_v27, %v1624_v8  ;;  %v1636_v42 = vsel %vm1498_vm0, %v1624_v8, %v1608_v56  ;;  %v1704_v62 = vsub.f32 %v4467_v18, %v4017_v25  ;;  %v1809_v61 = vmul.f32 1.442695, %v1802_v20 }
 0x3f7   : > { %v1659_v4 = vmul.f32 %v1628_v43, %v1599_v22  ;;  %v1660_v55 = vmul.f32 %v1636_v42, %v1600_v46  ;;  %1747 = vrot.lane.b32.xlu1 %v1669_v32, %s3432_s26  ;;  %v4448_v17 = vmul.f32 %v1682_v33, %v1670_v21  ;;  %v1703_v3 = vsub.f32 %v4474_v40, %v4009_v39 }
 0x3f8   : > { %1733 = vrot.lane.b32.xlu0 %v1670_v21, %s3432_s26  ;;  %v1716_v0 = vmul.f32 0.83333313, %v1704_v62 }
 0x3f9   : > { %v1672_v12 = vadd.f32 %v1660_v55, %v4324_v30  ;;  %v1671_v28 = vadd.f32 %v1659_v4, %v4326_v49  ;;  %v1800_v30 = vsub.f32 0.0, %v4773_v54  ;;  %v1801_v49 = vsub.f32 0.0, %v4775_v13 }
 0x3fa   : > { %v1715_v25 = vmul.f32 0.83333313, %v1703_v3  ;;  %v1706_v4 = vsub.f32 %v4474_v40, %v4773_v54 }
 0x3fb   : > { %1749 = vrot.lane.b32.xlu1 %v1672_v12, %s3432_s26  ;;  %v4456_v5 = vmul.f32 %v1684_v26, %v1672_v12  ;;  %v4458_v11 = vmul.f32 %v1683_v47, %v1671_v28  ;;  %v1805_v19 = vmul.f32 1.442695, %v1800_v30  ;;  %v1807_v35 = vmul.f32 1.442695, %v1801_v49 }
 0x3fc   : > { %1739 = vrot.lane.b32.xlu0 %v1668_v63, %s3432_s26  ;;  %v4788_v63 = vld [vmem:[#allocation25_spill] sm:$0xff] }
 0x3fd   : > { %3227 = vpow2.f32 %v1805_v19  ;;  %v4789_v2 = vsub.f32 %v4788_v63, %v4027_v45  ;;  %v4790_v12 = vsub.f32 %v4788_v63, %v4776_v59  ;;  %v1718_v59 = vmul.f32 0.83333313, %v1706_v4 }
 0x3fe   : > { %3229 = vpow2.f32 %v1807_v35  ;;  %v3226_v32 = vpop.eup %3225  ;;  %v4791_v3 = vsub.f32 %v4788_v63, %v4781_v24 }
 0x3ff   : > { %1741 = vrot.lane.b32.xlu1 %v1671_v28, %s3432_s26  ;;  %3231 = vpow2.f32 %v1809_v61  ;;  %v1717_v31 = vmul.f32 0.83333313, %v4789_v2  ;;  %v1811_v21 = vadd.f32 1.0, %v3226_v32  ;;  %v1720_v28 = vmul.f32 0.83333313, %v4790_v12 }
 0x401   : > { %3233 = vrcp.f32 %v1811_v21 }
 0x407   : > { %v3228_v33 = vpop.eup %3227 }
 0x408   : > { %v3230_v55 = vpop.eup %3229 }
 0x409   : > { %v3232_v51 = vpop.eup %3231  ;;  %v1813_v14 = vadd.f32 1.0, %v3230_v55 }
 0x459   : > { %v1744_v34 = vpop.permute.xlu1 %1743  ;;  %v1736_v56 = vpop.permute.xlu0 %1735 }
 0x45a   : > { %v1751_v27 = vsel %vm1498_vm0, %v1736_v56, %v1744_v34 }
 0x45b   : > { %v1776_v29 = vmul.f32 %v1751_v27, %v1716_v0  ;;  %v1723_v27 = vmul.f32 0.83333313, %v4791_v3 }
 0x45d   : > { %v1728_v58 = vpop.permute.xlu0 %1727  ;;  %v1788_v23 = vadd.f32 %v1776_v29, %v4370_v57  ;;  %v1707_v57 = vsub.f32 %v4467_v18, %v4048_v50  ;;  %v1812_v50 = vadd.f32 1.0, %v3228_v33 }
 0x45e   : > { %v1755_v22 = vsel %vm1498_vm0, %v1728_v58, %v1736_v56  ;;  %v1759_v53 = vsel %vm1498_vm0, %v1744_v34, %v1728_v58  ;;  %v1814_v56 = vadd.f32 1.0, %v3232_v51  ;;  %v1710_v58 = vsub.f32 %v4467_v18, %v4774_v41  ;;  %v3234_v41 = vpop.eup %3233 }
 0x45f   : > { %v1775_v46 = vmul.f32 %v1755_v22, %v1715_v25  ;;  %v1777_v8 = vmul.f32 %v1759_v53, %v1717_v31  ;;  %1887 = vmatprep.mubr.f32.mxu1 %v1788_v23  ;;  %v1719_v30 = vmul.f32 0.83333313, %v1707_v57  ;;  %3235 = vrcp.f32 %v1812_v50 }
 0x460   : > { %3237 = vrcp.f32 %v1813_v14  ;;  %v1709_v31 = vsub.f32 %v4474_v40, %v4775_v13  ;;  %v1713_v53 = vsub.f32 %v4467_v18, %v4783_v38  ;;  %v1722_v21 = vmul.f32 0.83333313, %v1710_v58 }
 0x461   : > { %v1787_v43 = vadd.f32 %v1775_v46, %v4368_v37  ;;  %v1730_v42 = vpop.permute.xlu1 %1729  ;;  %v1789_v45 = vadd.f32 %v1777_v8, %v4376_v15  ;;  %v1263_v37 = vld [vmem:[%s4717_s5 + $0x10] sm:$0xff]  ;;  %v1264_v15 = vld [vmem:[%s4717_s5 + $0x18] sm:$0xff]  ;;  %3239 = vrcp.f32 %v1814_v56  ;;  %v1819_v4 = vmul.f32 %v3234_v41, %v4009_v39 }
 0x462   : > { %v1746_v26 = vpop.permute.xlu0 %1745  ;;  %v3023_v61 = vpack.c.bf16 %v1264_v15, %v1263_v37  ;;  %v1721_v8 = vmul.f32 0.83333313, %v1709_v31  ;;  %v1725_v38 = vmul.f32 0.83333313, %v1713_v53 }
 0x463   : > { %v1760_v47 = vsel %vm1498_vm0, %v1746_v26, %v1730_v42  ;;  %1888 = vmatmul.mubr.f32.vlgmr.msra.gmra.mrb[12].mxu1 %v1787_v43  ;;  %2783 = vmatprep.mubr.f32.mxu0 %v1789_v45 }
 0x464   : > { %v1780_v10 = vmul.f32 %v1760_v47, %v1720_v28 }
 0x465   : > { %v1738_v49 = vpop.permute.xlu1 %1737 }
 0x466   : > { %v1792_v19 = vadd.f32 %v1780_v10, %v4408_v52  ;;  %v1752_v20 = vsel %vm1498_vm0, %v1738_v49, %v1746_v26  ;;  %v1756_v35 = vsel %vm1498_vm0, %v1730_v42, %v1738_v49  ;;  %v1732_v62 = vpop.permute.xlu0 %1731 }
 0x467   : > { %v1778_v34 = vmul.f32 %v1756_v35, %v1718_v59  ;;  %v1779_v0 = vmul.f32 %v1752_v20, %v1719_v30 }
 0x468   : > { %2784 = vmatmul.mubr.f32.vlgmr.msra.gmra.mrb[8].mxu0 %v1792_v19  ;;  %v2578_v19 = vld [vmem:[%s4719_s7] ss:$0 sm:$0xff] }
 0x469   : > { %v1748_v29 = vpop.permute.xlu1 %1747  ;;  %v1791_v52 = vadd.f32 %v1779_v0, %v4391_v16  ;;  %v1790_v32 = vadd.f32 %v1778_v34, %v4417_v36  ;;  %3022 = vmatpush3.bf16.msra.mxu0 %v4419_v60  ;;  %v1712_v16 = vsub.f32 %v4474_v40, %v4778_v1  ;;  %v4792_v36 = vsub.f32 %v4788_v63, %v4785_v6  ;;  %v3236_v57 = vpop.eup %3235 }
 0x46a   : > { %v1761_v25 = vsel %vm1498_vm0, %v1748_v29, %v1732_v62  ;;  %v1734_v2 = vpop.permute.xlu0 %1733  ;;  %3024 = vmatprep.subr.bf16.mxu0 %v3023_v61  ;;  %v3238_v47 = vpop.eup %3237  ;;  %v1820_v39 = vmul.f32 %v3236_v57, %v4773_v54 }
 0x46b   : > { %v1783_v24 = vmul.f32 %v1761_v25, %v1723_v27  ;;  %1892 = vmatprep.mubr.f32.mxu1 %v1791_v52  ;;  %v1726_v60 = vmul.f32 0.83333313, %v4792_v36  ;;  %v1724_v42 = vmul.f32 0.83333313, %v1712_v16  ;;  %v3240_v44 = vpop.eup %3239  ;;  %v1821_v10 = vmul.f32 %v3238_v47, %v4775_v13  ;;  %v2093_v36 = vld [vmem:[%s4721_s9] sm:$0xff]  ;;  %v2107_v47 = vld [vmem:[%s4721_s9 + $0x70] sm:$0xff] }
 0x46c   : > { %1893 = vmatmul.mubr.f32.gmra.mrb[14].mxu1 %v1790_v32  ;;  %v4793_v25 = vmov 0.0  }
 0x46d   : > { %v1750_v23 = vpop.permute.xlu1 %1749  ;;  %v1795_v22 = vadd.f32 %v1783_v24, %v4431_v48  ;;  %3026 = vmatpush3.bf16.msra.mxu0 %v3023_v61  ;;  %v2579_v61 = vld [vmem:[%s4719_s7 + $0x1] ss:$0 sm:$0xff] }
 0x46e   : > { %v1762_v46 = vsel %vm1498_vm0, %v1750_v23, %v1734_v2  ;;  %v1740_v33 = vpop.permute.xlu0 %1739 }
 0x46f   : > { %v1786_v40 = vmul.f32 %v1762_v46, %v1726_v60  ;;  %v1753_v43 = vsel %vm1498_vm0, %v1740_v33, %v1748_v29  ;;  %v1757_v6 = vsel %vm1498_vm0, %v1732_v62, %v1740_v33  ;;  %2786 = vmatprep.mubr.f32.mxu0 %v1795_v22  ;;  %v2094_v60 = vld [vmem:[%s4721_s9 + $0x8] sm:$0xff]  ;;  %v2096_v22 = vld [vmem:[%s4721_s9 + $0x18] sm:$0xff]  ;;  %v2097_v33 = vld [vmem:[%s4721_s9 + $0x20] sm:$0xff] }
 0x470   : > { %v1781_v48 = vmul.f32 %v1757_v6, %v1721_v8  ;;  %v1782_v63 = vmul.f32 %v1753_v43, %v1722_v21  ;;  %v3027_v46 = vpack.c.bf16 %v2094_v60, %v2093_v36  ;;  %v2099_v6 = vld [vmem:[%s4721_s9 + $0x30] sm:$0xff] }
 0x471   : > { %v1742_v18 = vpop.permute.xlu1 %1741  ;;  %v1798_v45 = vadd.f32 %v1786_v40, %v4456_v5  ;;  %v2098_v40 = vld [vmem:[%s4721_s9 + $0x28] sm:$0xff] }
 0x472   : > { %v1754_v55 = vsel %vm1498_vm0, %v1742_v18, %v1750_v23  ;;  %v1758_v12 = vsel %vm1498_vm0, %v1734_v2, %v1742_v18  ;;  %v1794_v28 = vadd.f32 %v1782_v63, %v4433_v9  ;;  %v1793_v26 = vadd.f32 %v1781_v48, %v4435_v7  ;;  %v2095_v23 = vld [vmem:[%s4721_s9 + $0x10] sm:$0xff]  ;;  %3028 = vmatprep.subr.bf16.mxu1 %v3027_v46  ;;  %v2100_v48 = vld [vmem:[%s4721_s9 + $0x38] sm:$0xff] }
 0x473   : > { %v1784_v37 = vmul.f32 %v1758_v12, %v1724_v42  ;;  %v1785_v15 = vmul.f32 %v1754_v55, %v1725_v38  ;;  %2787 = vmatmul.mubr.f32.gmra.mrb[10].mxu0 %v1798_v45  ;;  %v1822_v9 = vmul.f32 %v3240_v44, %v4778_v1  ;;  %v3031_v21 = vpack.c.bf16 %v2096_v22, %v2095_v23  ;;  %v2101_v42 = vld [vmem:[%s4721_s9 + $0x40] sm:$0xff]  ;;  %v2102_v38 = vld [vmem:[%s4721_s9 + $0x48] sm:$0xff]  ;;  %v2103_v45 = vld [vmem:[%s4721_s9 + $0x50] sm:$0xff] }
 0x474   : > { %1897 = vmatprep.mubr.f32.mxu1 %v1794_v28  ;;  %2797 = vmatprep.mubr.msk.f32.mxu0 %vm1993_vm1, %v1819_v4  ;;  %v3035_v43 = vpack.c.bf16 %v2098_v40, %v2097_v33  ;;  %v3039_v63 = vpack.c.bf16 %v2100_v48, %v2099_v6  ;;  %v3043_v18 = vpack.c.bf16 %v2102_v38, %v2101_v42  ;;  %v2104_v4 = vld [vmem:[%s4721_s9 + $0x58] sm:$0xff]  ;;  %v2105_v55 = vld [vmem:[%s4721_s9 + $0x60] sm:$0xff]  ;;  %v2106_v12 = vld [vmem:[%s4721_s9 + $0x68] sm:$0xff] }
 0x475   : > { %1898 = vmatmul.mubr.f32.gmra.mrb[16].mxu1 %v1793_v26  ;;  %v1797_v5 = vadd.f32 %v1785_v15, %v4458_v11  ;;  %v1796_v50 = vadd.f32 %v1784_v37, %v4448_v17  ;;  %v3047_v57 = vpack.c.bf16 %v2104_v4, %v2103_v45  ;;  %v3051_v28 = vpack.c.bf16 %v2106_v12, %v2105_v55  ;;  %v2584_v26 = vld [vmem:[%s4719_s7 + $0x2] ss:$0 sm:$0xff]  ;;  %v2108_v37 = vld [vmem:[%s4721_s9 + $0x78] sm:$0xff]  ;;  %v2585_v45 = vld [vmem:[%s4719_s7 + $0x3] ss:$0 sm:$0xff] }
 0x476   : > { %3030 = vmatpush3.bf16.msra.mxu1 %v3027_v46 }
 0x477   : > { %1902 = vmatprep.mubr.f32.mxu1 %v1797_v5  ;;  %2798 = vmatmul.mubr.msk.f32.vlgmr.msra.gmra.mrb[8].mxu0 %vm1993_vm1, %v1820_v39  ;;  %v3055_v5 = vpack.c.bf16 %v2108_v37, %v2107_v47 }
 0x478   : > { %2800 = vmatprep.mubr.msk.f32.mxu0 %vm1993_vm1, %v1821_v10  ;;  %3032 = vmatprep.subr.bf16.mxu1 %v3031_v21 }
 0x479   : > { %1903 = vmatmul.mubr.f32.gmra.mrb[18].mxu1 %v1796_v50 }
 0x47a   : > { %3034 = vmatpush3.bf16.msra.mxu1 %v3031_v21 }
 0x47b   : > { %2801 = vmatmul.mubr.msk.f32.gmra.mrb[10].mxu0 %vm1993_vm1, %v1822_v9  ;;  %3036 = vmatprep.subr.bf16.mxu1 %v3035_v43 }
 0x47e   : > { %3038 = vmatpush3.bf16.msra.mxu1 %v3035_v43 }
 0x47f   : > { %3040 = vmatprep.subr.bf16.mxu1 %v3039_v63 }
 0x482   : > { %3042 = vmatpush3.bf16.msra.mxu1 %v3039_v63 }
 0x483   : > { %3044 = vmatprep.subr.bf16.mxu1 %v3043_v18 }
 0x486   : > { %3046 = vmatpush3.bf16.msra.mxu1 %v3043_v18 }
 0x487   : > { %3048 = vmatprep.subr.bf16.mxu1 %v3047_v57 }
 0x48a   : > { %3050 = vmatpush3.bf16.msra.mxu1 %v3047_v57 }
 0x48b   : > { %3052 = vmatprep.subr.bf16.mxu1 %v3051_v28 }
 0x48e   : > { %3054 = vmatpush3.bf16.msra.mxu1 %v3051_v28 }
 0x48f   : > { %3056 = vmatprep.subr.bf16.mxu1 %v3055_v5 }
 0x492   : > { %3058 = vmatpush3.bf16.msra.mxu1 %v3055_v5 }
 0x536   : > { %v2675_v7 = vpop.f32.mrb[12].mxu1 }
 0x537   : > { %v2676_v54 = vpop.f32.mrb[13].mxu1 }
 0x538   : > { %v2677_v51 = vadd.f32 %v2676_v54, %v2675_v7 }
 0x53f   : > { %v2678_v59 = vpop.f32.mrb[14].mxu1 }
 0x540   : > { %v2679_v11 = vpop.f32.mrb[15].mxu1 }
 0x541   : > { %v2680_v30 = vadd.f32 %v2679_v11, %v2678_v59 }
 0x548   : > { %v2681_v17 = vpop.f32.mrb[16].mxu1 }
 0x549   : > { %v2682_v49 = vpop.f32.mrb[17].mxu1 }
 0x54a   : > { %v2683_v14 = vadd.f32 %v2682_v49, %v2681_v17  ;;  %v2799_v13 = vpop.f32.mrb[8].mxu0  ;;  %v2091_v17 = vld [vmem:[%s4720_s8] sm:$0xff]  ;;  %v2092_v49 = vld [vmem:[%s4720_s8 + $0x8] sm:$0xff] }
 0x54b   : > { %v4556_v20 = vadd.f32 %v2799_v13, %v2680_v30  ;;  %v2072_v35 = vpop.f32.mrb[9].mxu0 }
 0x54c   : > { %v4558_v1 = vadd.f32 %v2677_v51, %v2072_v35  ;;  %v2684_v62 = vpop.f32.mrb[18].mxu1  ;;  %v4670_v35 = vpack.c.bf16 %v2092_v49, %v2091_v17 }
 0x54d   : > { %v2685_v34 = vpop.f32.mrb[19].mxu1  ;;  %v4564_v0 = vsub.f32 %v4556_v20, %v2578_v19  ;;  %vm2128_vm3 = vcmp.lt.f32.partialorder %v4556_v20, %v2579_v61  ;;  %v2153_v39 = vsub.f32 %v2584_v26, %v4556_v20  ;;  %v2210_v21 = vsub.f32 0.0, %v4556_v20 }
 0x54e   : > { %v2686_v56 = vadd.f32 %v2685_v34, %v2684_v62  ;;  %v2802_v3 = vpop.f32.mrb[10].mxu0  ;;  %v4567_v27 = vsub.f32 %v4558_v1, %v2578_v19  ;;  %vm2127_vm5 = vcmp.lt.f32.partialorder %v4558_v1, %v2579_v61  ;;  %v2152_v15 = vsub.f32 %v2584_v26, %v4558_v1  ;;  %3060 = vmatprep.subr.bf16.mxu1 %v4670_v35 }
 0x54f   : > { %v2082_v29 = vpop.f32.mrb[11].mxu0  ;;  %vm2119_vm2 = vcmp.ge.f32.partialorder %v4564_v0, 0.0  ;;  %v2144_v44 = vmul.f32 2.0, %v4564_v0  ;;  %v2157_v7 = vmul.f32 2.0, %v2153_v39  ;;  %v2215_v43 = vmul.f32 1.442695, %v2210_v21 }
 0x550   : > { %v4571_v52 = vadd.f32 %v2802_v3, %v2686_v56  ;;  %v4573_v32 = vadd.f32 %v2683_v14, %v2082_v29  ;;  %vm2118_vm4 = vcmp.ge.f32.partialorder %v4567_v27, 0.0  ;;  %vm2132_vm6 = vmand %vm2119_vm2, %vm2128_vm3  ;;  %v2143_v50 = vmul.f32 2.0, %v4567_v27 }
 0x551   : > { %vm2131_vm7 = vmand %vm2118_vm4, %vm2127_vm5  ;;  %v4578_v2 = vsel %vm2132_vm6, 1.0, %v4793_v25  ;;  %v2156_v9 = vmul.f32 2.0, %v2152_v15  ;;  %v2185_v55 = vsub.f32 %v2585_v45, %v4558_v1  ;;  %v2186_v12 = vsub.f32 %v2585_v45, %v4556_v20 }
 0x552   : > { %v4581_v31 = vsel %vm2131_vm7, 1.0, %v4793_v25  ;;  %v4586_v24 = vsub.f32 %v4573_v32, %v2578_v19  ;;  %v4589_v16 = vsub.f32 %v4571_v52, %v2578_v19  ;;  %vm2129_vm11 = vcmp.lt.f32.partialorder %v4573_v32, %v2579_v61 }
 0x553   : > { %v3199_v58 = vpack.i.bf16 %v4578_v2, %v4581_v31  ;;  %vm2130_vm12 = vcmp.lt.f32.partialorder %v4571_v52, %v2579_v61  ;;  %v2154_v59 = vsub.f32 %v2584_v26, %v4573_v32  ;;  %v2155_v11 = vsub.f32 %v2584_v26, %v4571_v52 }
 0x554   : > { %vm2120_vm8 = vcmp.ge.f32.partialorder %v4586_v24, 0.0  ;;  %vm2121_vm10 = vcmp.ge.f32.partialorder %v4589_v16, 0.0  ;;  %v2168_v30 = vmul.f32 %v4581_v31, %v2143_v50  ;;  %v2169_v19 = vmul.f32 %v4578_v2, %v2144_v44 }
 0x555   : > { %3200 = vrot.lane.b32.xlu0 %v3199_v58, %s3431_s16  ;;  %vm2133_vm13 = vmand %vm2120_vm8, %vm2129_vm11  ;;  %v2145_v34 = vmul.f32 2.0, %v4586_v24  ;;  %v2146_v56 = vmul.f32 2.0, %v4589_v16  ;;  %v2158_v29 = vmul.f32 2.0, %v2154_v59  ;;  %v2211_v40 = vsub.f32 0.0, %v4573_v32 }
 0x556   : > { %vm2134_vm14 = vmand %vm2121_vm10, %vm2130_vm12  ;;  %v4609_v53 = vsel %vm2133_vm13, 1.0, %v4793_v25  ;;  %v2212_v6 = vsub.f32 0.0, %v4571_v52 }
 0x557   : > { %v4612_v41 = vsel %vm2134_vm14, 1.0, %v4793_v25  ;;  %v2159_v25 = vmul.f32 2.0, %v2155_v11  ;;  %v2170_v60 = vmul.f32 %v4609_v53, %v2145_v34 }
 0x558   : > { %v3204_v8 = vpack.i.bf16 %v4612_v41, %v4609_v53  ;;  %v2171_v23 = vmul.f32 %v4612_v41, %v2146_v56  ;;  %v2217_v53 = vmul.f32 1.442695, %v2211_v40  ;;  %v2219_v41 = vmul.f32 1.442695, %v2212_v6 }
 0x55a   : > { %3205 = vrot.lane.b32.xlu1 %v3204_v8, %s3431_s16  ;;  %v2209_v8 = vsub.f32 0.0, %v4558_v1 }
 0x55c   : > { %v2213_v33 = vmul.f32 1.442695, %v2209_v8 }
 0x55e   : > { %3241 = vpow2.f32 %v2213_v33 }
 0x55f   : > { %3243 = vpow2.f32 %v2215_v43 }
 0x560   : > { %3245 = vpow2.f32 %v2217_v53 }
 0x561   : > { %3247 = vpow2.f32 %v2219_v41 }
 0x568   : > { %v3242_v48 = vpop.eup %3241 }
 0x569   : > { %v3244_v63 = vpop.eup %3243  ;;  %v2221_v42 = vadd.f32 1.0, %v3242_v48 }
 0x56a   : > { %v3246_v38 = vpop.eup %3245  ;;  %v2222_v18 = vadd.f32 1.0, %v3244_v63 }
 0x56b   : > { %v3248_v4 = vpop.eup %3247  ;;  %3249 = vrcp.f32 %v2221_v42  ;;  %v2223_v57 = vadd.f32 1.0, %v3246_v38 }
 0x56c   : > { %3251 = vrcp.f32 %v2222_v18  ;;  %v2224_v47 = vadd.f32 1.0, %v3248_v4 }
 0x56d   : > { %3253 = vrcp.f32 %v2223_v57 }
 0x56e   : > { %3255 = vrcp.f32 %v2224_v47 }
 0x5c7   : > { %v3201_v10 = vpop.permute.xlu0 %3200 }
 0x5c8   : > { %v3203_v54 = vunpack.i.h.bf16 %v3201_v10  ;;  %v3202_v51 = vunpack.i.l.bf16 %v3201_v10  ;;  %v2187_v10 = vsub.f32 %v2585_v45, %v4573_v32 }
 0x5ca   : > { %v2173_v14 = vmul.f32 %v3203_v54, %v2157_v7  ;;  %v2172_v13 = vmul.f32 %v3202_v51, %v2156_v9  ;;  %v2188_v9 = vsub.f32 %v2585_v45, %v4571_v52 }
 0x5cc   : > { %v2176_v62 = vadd.f32 %v2172_v13, %v2168_v30  ;;  %v2177_v61 = vadd.f32 %v2173_v14, %v2169_v19  ;;  %v3206_v3 = vpop.permute.xlu1 %3205 }
 0x5cd   : > { %v3208_v31 = vunpack.i.h.bf16 %v3206_v3  ;;  %v3207_v58 = vunpack.i.l.bf16 %v3206_v3 }
 0x5ce   : > { %2189 = vrot.lane.b32.xlu0 %v2176_v62, %s3431_s16  ;;  %2191 = vrot.lane.b32.xlu1 %v2177_v61, %s3431_s16  ;;  %v2197_v37 = vmul.f32 %v2176_v62, %v4567_v27  ;;  %v2198_v39 = vmul.f32 %v2177_v61, %v4564_v0  ;;  %v3250_v0 = vpop.eup %3249 }
 0x5cf   : > { %v2175_v2 = vmul.f32 %v3208_v31, %v2159_v25  ;;  %v2174_v36 = vmul.f32 %v3207_v58, %v2158_v29  ;;  %v3252_v49 = vpop.eup %3251  ;;  %v2229_v14 = vmul.f32 %v3250_v0, %v4558_v1 }
 0x5d0   : > { %v3254_v13 = vpop.eup %3253 }
 0x5d1   : > { %v2178_v22 = vadd.f32 %v2174_v36, %v2170_v60  ;;  %v2179_v46 = vadd.f32 %v2175_v2, %v2171_v23  ;;  %v3256_v19 = vpop.eup %3255 }
 0x5d3   : > { %2193 = vrot.lane.b32.xlu0 %v2178_v22, %s3431_s16  ;;  %2195 = vrot.lane.b32.xlu1 %v2179_v46, %s3431_s16  ;;  %v2199_v51 = vmul.f32 %v2178_v22, %v4586_v24  ;;  %v2200_v27 = vmul.f32 %v2179_v46, %v4589_v16  ;;  %v2230_v24 = vmul.f32 %v3252_v49, %v4556_v20 }
 0x5d4   : > { %v2231_v16 = vmul.f32 %v3254_v13, %v4573_v32 }
 0x640   : > { %v2190_v28 = vpop.permute.xlu0 %2189  ;;  %v2192_v26 = vpop.permute.xlu1 %2191 }
 0x641   : > { %v2201_v15 = vmul.f32 %v2190_v28, %v2185_v55  ;;  %v2202_v5 = vmul.f32 %v2192_v26, %v2186_v12 }
 0x643   : > { %v2205_v50 = vadd.f32 %v2201_v15, %v2197_v37  ;;  %v2206_v44 = vadd.f32 %v2202_v5, %v2198_v39 }
 0x645   : > { %2835 = vmatprep.mubr.f32.mxu1 %v2205_v50  ;;  %v2194_v7 = vpop.permute.xlu0 %2193  ;;  %v2196_v54 = vpop.permute.xlu1 %2195 }
 0x646   : > { %2836 = vmatmul.mubr.f32.vlgmr.msra.gmra.mrb[20].mxu1 %v2206_v44  ;;  %v2203_v59 = vmul.f32 %v2194_v7, %v2187_v10  ;;  %v2204_v11 = vmul.f32 %v2196_v54, %v2188_v9 }
 0x647   : > { %3062 = vmatpush3.bf16.msra.mxu1 %v4670_v35  ;;  %v2232_v35 = vmul.f32 %v3256_v19, %v4571_v52 }
 0x648   : > { %v2207_v30 = vadd.f32 %v2203_v59, %v2199_v51  ;;  %v2208_v17 = vadd.f32 %v2204_v11, %v2200_v27 }
 0x64a   : > { %2838 = vmatprep.mubr.f32.mxu1 %v2207_v30 }
 0x64b   : > { %2839 = vmatmul.mubr.f32.gmra.mrb[22].mxu1 %v2208_v17 }
 0x64c   : > { %2845 = vmatprep.mubr.msk.f32.mxu1 %vm1074_vm9, %v2229_v14 }
 0x64f   : > { %2846 = vmatmul.mubr.msk.f32.vlgmr.msra.gmra.mrb[20].mxu1 %vm1074_vm9, %v2230_v24 }
 0x650   : > { %2848 = vmatprep.mubr.msk.f32.mxu1 %vm1074_vm9, %v2231_v16 }
 0x653   : > { %2849 = vmatmul.mubr.msk.f32.gmra.mrb[22].mxu1 %vm1074_vm9, %v2232_v35 }
 0x722   : > { %v2847_v1 = vpop.f32.mrb[20].mxu1 }
 0x723   : > { %v2396_v62 = vpop.f32.mrb[21].mxu1  ;;  %2417 = vst.msk [vmem:[%s433_s30 + $0x8] sm:$0xff] %vm2415_vm15, %v2847_v1 }
 0x724   : > { %2416 = vst.msk [vmem:[%s433_s30] sm:$0xff] %vm2415_vm15, %v2396_v62 }
 0x726   : > { %v2850_v20 = vpop.f32.mrb[22].mxu1 }
 0x727   : > { %v2406_v32 = vpop.f32.mrb[23].mxu1  ;;  %2419 = vst.msk [vmem:[%s433_s30 + $0x18] sm:$0xff] %vm2415_vm15, %v2850_v20 }
 0x728   : > { %2418 = vst.msk [vmem:[%s433_s30 + $0x10] sm:$0xff] %vm2415_vm15, %v2406_v32 }
 0x729 PF: > { %s23_s13 = sadd.s32 1, %s3419_s13  }
 0x72a   : > { %p20_p7 = scmp.ge.s32.totalorder %s23_s13, 4  }
 0x72c   :  { %22 = sbr.rel (!%p20_p7) target bundleno = 3 (0x3), region = 119 }
 0x733   :  { %2442 = vsyncpa [#allocation3], 1 }
 0x734   :  { %2444 = vsyncpa [#allocation3 + $0x1], 1 }
 0x735   :  { %2445 = vsyncpa [#allocation5], 1 }
 0x736   :  { %2446 = vsyncpa [#allocation8], 1 }

</bundles_post_ra>
